<compile_context>
chip_gen: v7x
topology: tpu7x:2x2x1
jax: 0.10.0
libtpu: 0.0.40
codegen_flags: <defaults>
</compile_context>

<pallas_src>
import functools

import jax
import jax.numpy as jnp
from jax import lax
from jax.experimental import pallas as pl
from jax.experimental.pallas import tpu as pltpu

EPS = 1e-5


# ----------------------------------------------------------------------------
# Fused Bottleneck kernel
# ----------------------------------------------------------------------------
def _bottleneck_kernel(x_ref, w1_ref, b1_ref, w2_ref, b2_ref, w3_ref, b3_ref,
                       *rest, stride, band, wo, has_proj):
    # rest = ([wsc_ref,] o_ref, y1p_ref)
    if has_proj:
        wsc_ref, o_ref, y1p_ref = rest
    else:
        wsc_ref = None
        o_ref, y1p_ref = rest

    jb = pl.program_id(1)                      # row-band index (sequential)
    hp, wp, cin = x_ref.shape                  # padded image block
    h, w = hp - 2, wp - 2
    planes = w1_ref.shape[1]
    c_out = w3_ref.shape[1]
    cdt = w1_ref.dtype                         # compute dtype (f32 or bf16)

    # ---- stage 1: conv1(1x1) + BN1 + ReLU over the whole image, once per image.
    # Computed on the padded image and masked so the 1-pixel border is exactly 0
    # (the zero padding the 3x3 conv needs).  Kept resident in VMEM across bands.
    @pl.when(jb == 0)
    def _():
        x2d = x_ref[...].reshape(hp * wp, cin)
        y1 = jnp.dot(x2d, w1_ref[...], preferred_element_type=jnp.float32)
        y1 = jnp.maximum(y1 + b1_ref[...], 0.0).reshape(hp, wp, planes)
        ri = lax.broadcasted_iota(jnp.int32, (hp, wp, planes), 0)
        ci = lax.broadcasted_iota(jnp.int32, (hp, wp, planes), 1)
        interior = (ri >= 1) & (ri <= h) & (ci >= 1) & (ci <= w)
        y1p_ref[...] = jnp.where(interior, y1, 0.0).astype(y1p_ref.dtype)

    # ---- stage 2: conv2(3x3, stride, pad=1) + BN2 + ReLU on this row band.
    span_h = (band - 1) * stride + 1
    span_w = (wo - 1) * stride + 1
    r0 = pl.multiple_of(jb * (band * stride), band * stride)
    win = y1p_ref[pl.ds(r0, span_h + 2), :, :]              # (span_h+2, wp, P)
    acc = jnp.zeros((band * wo, planes), jnp.float32)
    for kh in range(3):
        for kw in range(3):
            patch = lax.slice(win, (kh, kw, 0),
                              (kh + span_h, kw + span_w, planes),
                              (stride, stride, 1))          # (band, wo, P)
            acc = acc + jnp.dot(patch.reshape(band * wo, planes),
                                w2_ref[kh * 3 + kw],
                                preferred_element_type=jnp.float32)
    y2 = jnp.maximum(acc + b2_ref[...], 0.0).astype(cdt)    # (band*wo, P)

    # ---- stage 3: conv3(1x1) + BN3 + shortcut + add + ReLU.
    main = jnp.dot(y2, w3_ref[...],
                   preferred_element_type=jnp.float32) + b3_ref[...]
    # shortcut reads the (strided) original pixels: padded index = orig + 1
    xwin = x_ref[pl.ds(r0 + 1, span_h), :, :]               # (span_h, wp, Cin)
    xs = lax.slice(xwin, (0, 1, 0), (span_h, 1 + span_w, cin),
                   (stride, stride, 1))                     # (band, wo, Cin)
    xs2d = xs.reshape(band * wo, cin)
    if has_proj:
        sc = jnp.dot(xs2d, wsc_ref[...], preferred_element_type=jnp.float32)
    else:
        sc = xs2d.astype(jnp.float32)
    out = jnp.maximum(main + sc, 0.0)
    o_ref[...] = out.reshape(band, wo, c_out).astype(o_ref.dtype)


# ----------------------------------------------------------------------------
# Band / VMEM sizing helpers
# ----------------------------------------------------------------------------
def _pick_band(ho, wo, w, planes, c_out, stride, itemsize, budget_bytes=6 << 20):
    """Largest divisor of `ho` whose per-band working set fits the budget."""
    def band_bytes(b):
        rows = b * wo
        out_b = 2 * rows * c_out * itemsize                 # double-buffered output
        acc_b = rows * (planes + c_out) * 4                 # f32 accumulators
        win_b = ((b - 1) * stride + 3) * (w + 2) * planes * itemsize
        return out_b + acc_b + win_b

    best = 1
    for b in range(1, ho + 1):
        if ho % b == 0 and band_bytes(b) <= budget_bytes:
            best = b
    # TODO(synk): a ragged ho (no good divisor) would need a masked tail band.
    return best


# ----------------------------------------------------------------------------
# Bottleneck forward (Pallas path)
# ----------------------------------------------------------------------------
def bottleneck_forward(x_nchw, params, stride, *, compute_dtype=None, band=None):
    n, cin, h, w = x_nchw.shape
    planes = params["w1"].shape[1]
    c_out = params["w3"].shape[1]
    ho = (h + 2 - 3) // stride + 1
    wo = (w + 2 - 3) // stride + 1
    has_proj = "wsc" in params
    cdt = jnp.dtype(compute_dtype) if compute_dtype is not None else x_nchw.dtype
    itemsize = jnp.dtype(cdt).itemsize

    if band is None:
        band = _pick_band(ho, wo, w, planes, c_out, stride, itemsize)
    assert ho % band == 0, (ho, band)
    nb = ho // band

    hp, wp = h + 2, w + 2
    x = jnp.transpose(x_nchw, (0, 2, 3, 1)).astype(cdt)          # NHWC
    xp = jnp.pad(x, ((0, 0), (1, 1), (1, 1), (0, 0)))            # 1-px border

    inputs = [xp,
              params["w1"].astype(cdt), params["b1"],
              params["w2"].astype(cdt), params["b2"],
              params["w3"].astype(cdt), params["b3"]]
    in_specs = [
        pl.BlockSpec((None, hp, wp, cin), lambda i, j: (i, 0, 0, 0)),
        pl.BlockSpec((cin, planes), lambda i, j: (0, 0)),
        pl.BlockSpec((1, planes), lambda i, j: (0, 0)),
        pl.BlockSpec((9, planes, planes), lambda i, j: (0, 0, 0)),
        pl.BlockSpec((1, planes), lambda i, j: (0, 0)),
        pl.BlockSpec((planes, c_out), lambda i, j: (0, 0)),
        pl.BlockSpec((1, c_out), lambda i, j: (0, 0)),
    ]
    if has_proj:
        inputs.append(params["wsc"].astype(cdt))
        in_specs.append(pl.BlockSpec((cin, c_out), lambda i, j: (0, 0)))

    # Rough VMEM need: resident image + conv1 scratch + weights + band buffers.
    resident = (hp * wp * cin + hp * wp * planes) * itemsize
    weights = (cin * planes + 9 * planes * planes + planes * c_out
               + (cin * c_out if has_proj else 0)) * itemsize
    band_ws = 2 * band * wo * c_out * itemsize + band * wo * (planes + c_out) * 4
    need = 2 * resident + 2 * weights + 2 * band_ws + (1 << 20)
    vmem_limit = None if need < (16 << 20) else min(need, 64 << 20)

    out = pl.pallas_call(
        functools.partial(_bottleneck_kernel, stride=stride, band=band, wo=wo,
                          has_proj=has_proj),
        out_shape=jax.ShapeDtypeStruct((n, ho, wo, c_out), cdt),
        grid_spec=pltpu.PrefetchScalarGridSpec(
            num_scalar_prefetch=0,
            grid=(n, nb),
            in_specs=in_specs,
            out_specs=pl.BlockSpec((None, band, wo, c_out),
                                   lambda i, j: (i, j, 0, 0)),
            scratch_shapes=[pltpu.VMEM((hp, wp, planes), cdt)],
        ),
        compiler_params=pltpu.CompilerParams(
            dimension_semantics=("parallel", "arbitrary"),
            vmem_limit_bytes=vmem_limit),
    )(*inputs)

    return jnp.transpose(out, (0, 3, 1, 2))                      # back to NCHW


# ----------------------------------------------------------------------------
# Parameter init (deterministic), BN folding, pure-JAX reference
# ----------------------------------------------------------------------------
def init_raw_params(key, in_planes, planes, stride, expansion=4):
    exp_planes = expansion * planes
    ks = list(jax.random.split(key, 16))

    def conv_w(k, cout, cin, kh, kw):
        fan_in = cin * kh * kw
        return jax.random.normal(k, (cout, cin, kh, kw), jnp.float32) / jnp.sqrt(fan_in)

    def bn_p(k, c):
        k1, k2, k3, k4 = jax.random.split(k, 4)
        gamma = jax.random.uniform(k1, (c,), jnp.float32, 0.5, 1.5)
        beta = 0.1 * jax.random.normal(k2, (c,), jnp.float32)
        mean = 0.1 * jax.random.normal(k3, (c,), jnp.float32)
        var = jax.random.uniform(k4, (c,), jnp.float32, 0.5, 1.5)
        return (gamma, beta, mean, var)

    raw = {
        "c1": conv_w(ks[0], planes, in_planes, 1, 1),
        "bn1": bn_p(ks[1], planes),
        "c2": conv_w(ks[2], planes, planes, 3, 3),
        "bn2": bn_p(ks[3], planes),
        "c3": conv_w(ks[4], exp_planes, planes, 1, 1),
        "bn3": bn_p(ks[5], exp_planes),
        "csc": None,
        "bnsc": None,
    }
    if stride != 1 or in_planes != exp_planes:
        raw["csc"] = conv_w(ks[6], exp_planes, in_planes, 1, 1)
        raw["bnsc"] = bn_p(ks[7], exp_planes)
    return raw


def fold_bn(bn):
    gamma, beta, mean, var = bn
    scale = gamma / jnp.sqrt(var + EPS)
    bias = beta - mean * scale
    return scale.reshape(1, -1), bias.reshape(1, -1)


def raw_to_kernel_params(raw):
    """Fold BN scales into the conv weights; keep only per-channel biases."""
    s1, b1 = fold_bn(raw["bn1"])
    s2, b2 = fold_bn(raw["bn2"])
    s3, b3 = fold_bn(raw["bn3"])
    p = {}
    p["w1"] = jnp.transpose(raw["c1"][:, :, 0, 0]) * s1              # (Cin, P)
    p["b1"] = b1
    w2 = jnp.transpose(raw["c2"], (2, 3, 1, 0))                      # (3,3,P,P)
    w2 = w2 * s2.reshape(1, 1, 1, -1)
    p["w2"] = w2.reshape(9, w2.shape[2], w2.shape[3])                # (9, P, P)
    p["b2"] = b2
    p["w3"] = jnp.transpose(raw["c3"][:, :, 0, 0]) * s3              # (P, 4P)
    b3_total = b3
    if raw["csc"] is not None:
        ssc, bsc = fold_bn(raw["bnsc"])
        p["wsc"] = jnp.transpose(raw["csc"][:, :, 0, 0]) * ssc       # (Cin, 4P)
        b3_total = b3 + bsc                                          # fused bias
    p["b3"] = b3_total
    return p


def ref_forward(x, raw, stride):
    def conv(z, w, s, pad):
        return lax.conv_general_dilated(
            z, w, (s, s), pad, dimension_numbers=("NCHW", "OIHW", "NCHW"))

    def bn(z, params):
        gamma, beta, mean, var = params
        g = gamma / jnp.sqrt(var + EPS)
        b = beta - mean * g
        return z * g[None, :, None, None] + b[None, :, None, None]

    out = jax.nn.relu(bn(conv(x, raw["c1"], 1, "VALID"), raw["bn1"]))
    out = jax.nn.relu(bn(conv(out, raw["c2"], stride, [(1, 1), (1, 1)]), raw["bn2"]))
    out = bn(conv(out, raw["c3"], 1, "VALID"), raw["bn3"])
    if raw["csc"] is not None:
        sc = bn(conv(x, raw["csc"], stride, "VALID"), raw["bnsc"])
    else:
        sc = x
    return jax.nn.relu(out + sc)


# ----------------------------------------------------------------------------
if __name__ == "__main__":
    key = jax.random.PRNGKey(0)

    # (name, in_planes, planes, stride, N, H, W, compute_dtype, band, atol, rtol)
    cases = [
        ("proj_f32",      4, 4, 1, 2, 16, 16, jnp.float32,  4,    2e-4, 2e-4),
        ("proj_bf16",     4, 4, 1, 2, 16, 16, jnp.bfloat16, None, 0.25, 0.1),
        ("identity_f32", 16, 4, 1, 2, 16, 16, jnp.float32,  8,    2e-4, 2e-4),
    ]

    for idx, (name, cin, planes, stride, n, h, w, cdt, band, atol, rtol) in enumerate(cases):
        kx, kp = jax.random.split(jax.random.fold_in(key, idx))
        x = jax.random.normal(kx, (n, cin, h, w), jnp.float32)      # NCHW input
        raw = init_raw_params(kp, cin, planes, stride)
        params = raw_to_kernel_params(raw)

        out = bottleneck_forward(x, params, stride, compute_dtype=cdt, band=band)
        out = jax.block_until_ready(out).astype(jnp.float32)
        ref = jax.block_until_ready(ref_forward(x, raw, stride))

        ho = (h + 2 - 3) // stride + 1
        assert out.shape == (n, 4 * planes, ho, ho), (name, out.shape)
        max_err = float(jnp.max(jnp.abs(out - ref)))
        assert jnp.allclose(out, ref, atol=atol, rtol=rtol), (name, max_err)

    print("KERNEL_OK")
</pallas_src>

<mosaic_0001>
module attributes {stable_mosaic.version = 11 : i64} {
  func.func @_bottleneck_kernel(%arg0: i32, %arg1: i32, %arg2: memref<1x18x18x4xf32, #tpu.memory_space<vmem>>, %arg3: memref<4x4xf32, #tpu.memory_space<vmem>>, %arg4: memref<1x4xf32, #tpu.memory_space<vmem>>, %arg5: memref<9x4x4xf32, #tpu.memory_space<vmem>>, %arg6: memref<1x4xf32, #tpu.memory_space<vmem>>, %arg7: memref<4x16xf32, #tpu.memory_space<vmem>>, %arg8: memref<1x16xf32, #tpu.memory_space<vmem>>, %arg9: memref<4x16xf32, #tpu.memory_space<vmem>>, %arg10: memref<1x4x16x16xf32, #tpu.memory_space<vmem>>, %arg11: memref<18x18x4xf32, #tpu.memory_space<vmem>>) attributes {dimension_semantics = [#tpu.dimension_semantics<parallel>, #tpu.dimension_semantics<arbitrary>], iteration_bounds = array<i64: 2, 4>, scalar_prefetch = 0 : i64, scratch_operands = 1 : i64, tpu.core_type = #tpu.core_type<tc>, window_params = [{transform_indices = @transform_0, window_bounds = array<i64: 1, 18, 18, 4>}, {pipeline_mode = #tpu.pipeline_mode<synchronous>, transform_indices = @transform_1, window_bounds = array<i64: 4, 4>}, {pipeline_mode = #tpu.pipeline_mode<synchronous>, transform_indices = @transform_2, window_bounds = array<i64: 1, 4>}, {pipeline_mode = #tpu.pipeline_mode<synchronous>, transform_indices = @transform_3, window_bounds = array<i64: 9, 4, 4>}, {pipeline_mode = #tpu.pipeline_mode<synchronous>, transform_indices = @transform_4, window_bounds = array<i64: 1, 4>}, {pipeline_mode = #tpu.pipeline_mode<synchronous>, transform_indices = @transform_5, window_bounds = array<i64: 4, 16>}, {pipeline_mode = #tpu.pipeline_mode<synchronous>, transform_indices = @transform_6, window_bounds = array<i64: 1, 16>}, {pipeline_mode = #tpu.pipeline_mode<synchronous>, transform_indices = @transform_7, window_bounds = array<i64: 4, 16>}, {transform_indices = @transform_8, window_bounds = array<i64: 1, 4, 16, 16>}]} {
    %c0_i32 = arith.constant 0 : i32
    %0 = arith.cmpi eq, %arg1, %c0_i32 : i32
    %1 = arith.extui %0 : i1 to i32
    %c0_i32_0 = arith.constant 0 : i32
    %2 = arith.cmpi ne, %1, %c0_i32_0 : i32
    scf.if %2 {
      %c0_49 = arith.constant 0 : index
      %c0_50 = arith.constant 0 : index
      %c0_51 = arith.constant 0 : index
      %c0_52 = arith.constant 0 : index
      %87 = vector.load %arg2[%c0_49, %c0_50, %c0_51, %c0_52] : memref<1x18x18x4xf32, #tpu.memory_space<vmem>>, vector<1x18x18x4xf32>
      %88 = vector.shape_cast %87 : vector<1x18x18x4xf32> to vector<18x18x4xf32>
      %89 = vector.shape_cast %88 : vector<18x18x4xf32> to vector<324x4xf32>
      %c0_53 = arith.constant 0 : index
      %c0_54 = arith.constant 0 : index
      %90 = vector.load %arg3[%c0_53, %c0_54] : memref<4x4xf32, #tpu.memory_space<vmem>>, vector<4x4xf32>
      %cst_55 = arith.constant dense<0.000000e+00> : vector<324x4xf32>
      %91 = tpu.matmul %89, %90, %cst_55 {dimension_numbers = #tpu.dot_dimension_numbers<[1], [0], [0], [1], [0, 0, 1, 1], [], []>} : vector<324x4xf32>, vector<4x4xf32>, vector<324x4xf32> -> vector<324x4xf32>
      %c0_56 = arith.constant 0 : index
      %c0_57 = arith.constant 0 : index
      %92 = vector.load %arg4[%c0_56, %c0_57] : memref<1x4xf32, #tpu.memory_space<vmem>>, vector<1x4xf32>
      %93 = vector.broadcast %92 : vector<1x4xf32> to vector<324x4xf32>
      %94 = arith.addf %91, %93 : vector<324x4xf32>
      %cst_58 = arith.constant 0.000000e+00 : f32
      %95 = vector.broadcast %cst_58 : f32 to vector<324x4xf32>
      %96 = arith.maximumf %94, %95 : vector<324x4xf32>
      %97 = vector.shape_cast %96 : vector<324x4xf32> to vector<18x18x4xf32>
      %98 = tpu.iota {dimensions = array<i32: 0>} : vector<18x18x4xi32>
      %99 = tpu.iota {dimensions = array<i32: 1>} : vector<18x18x4xi32>
      %c1_i32_59 = arith.constant 1 : i32
      %100 = vector.broadcast %c1_i32_59 : i32 to vector<18x18x4xi32>
      %101 = arith.cmpi sge, %98, %100 : vector<18x18x4xi32>
      %c16_i32 = arith.constant 16 : i32
      %102 = vector.broadcast %c16_i32 : i32 to vector<18x18x4xi32>
      %103 = arith.cmpi sle, %98, %102 : vector<18x18x4xi32>
      %104 = arith.andi %101, %103 : vector<18x18x4xi1>
      %c1_i32_60 = arith.constant 1 : i32
      %105 = vector.broadcast %c1_i32_60 : i32 to vector<18x18x4xi32>
      %106 = arith.cmpi sge, %99, %105 : vector<18x18x4xi32>
      %107 = arith.andi %104, %106 : vector<18x18x4xi1>
      %c16_i32_61 = arith.constant 16 : i32
      %108 = vector.broadcast %c16_i32_61 : i32 to vector<18x18x4xi32>
      %109 = arith.cmpi sle, %99, %108 : vector<18x18x4xi32>
      %110 = arith.andi %107, %109 : vector<18x18x4xi1>
      %cst_62 = arith.constant 0.000000e+00 : f32
      %111 = vector.broadcast %cst_62 : f32 to vector<18x18x4xf32>
      %112 = arith.select %110, %97, %111 : vector<18x18x4xi1>, vector<18x18x4xf32>
      %c0_63 = arith.constant 0 : index
      %c0_64 = arith.constant 0 : index
      %c0_65 = arith.constant 0 : index
      %113 = vector.load %arg11[%c0_63, %c0_64, %c0_65] : memref<18x18x4xf32, #tpu.memory_space<vmem>>, vector<18x18x4xf32>
      tpu.vector_store %arg11[%c0_63, %c0_64, %c0_65], %112 {strides = array<i32>} : memref<18x18x4xf32, #tpu.memory_space<vmem>>, vector<18x18x4xf32>,
    } else {
    }
    %c4_i32 = arith.constant 4 : i32
    %3 = arith.muli %arg1, %c4_i32 : i32
    %4 = tpu.assume_multiple %3, 4 : i32
    %5 = arith.index_cast %4 : i32 to index
    %c0 = arith.constant 0 : index
    %c0_1 = arith.constant 0 : index
    %6 = vector.load %arg11[%5, %c0, %c0_1] : memref<18x18x4xf32, #tpu.memory_space<vmem>>, vector<6x18x4xf32>
    %cst = arith.constant 0.000000e+00 : f32
    %7 = vector.broadcast %cst : f32 to vector<64x4xf32>
    %8 = vector.extract_strided_slice %6 {offsets = [0, 0, 0], sizes = [4, 16, 4], strides = [1, 1, 1]} : vector<6x18x4xf32> to vector<4x16x4xf32>
    %9 = vector.shape_cast %8 : vector<4x16x4xf32> to vector<64x4xf32>
    %c0_2 = arith.constant 0 : index
    %c0_3 = arith.constant 0 : index
    %c0_4 = arith.constant 0 : index
    %10 = vector.load %arg5[%c0_2, %c0_3, %c0_4] : memref<9x4x4xf32, #tpu.memory_space<vmem>>, vector<1x4x4xf32>
    %11 = vector.shape_cast %10 : vector<1x4x4xf32> to vector<4x4xf32>
    %cst_5 = arith.constant dense<0.000000e+00> : vector<64x4xf32>
    %12 = tpu.matmul %9, %11, %cst_5 {dimension_numbers = #tpu.dot_dimension_numbers<[1], [0], [0], [1], [0, 0, 1, 1], [], []>} : vector<64x4xf32>, vector<4x4xf32>, vector<64x4xf32> -> vector<64x4xf32>
    %13 = arith.addf %7, %12 : vector<64x4xf32>
    %14 = vector.extract_strided_slice %6 {offsets = [0, 1, 0], sizes = [4, 16, 4], strides = [1, 1, 1]} : vector<6x18x4xf32> to vector<4x16x4xf32>
    %15 = vector.shape_cast %14 : vector<4x16x4xf32> to vector<64x4xf32>
    %c1 = arith.constant 1 : index
    %c0_6 = arith.constant 0 : index
    %c0_7 = arith.constant 0 : index
    %16 = vector.load %arg5[%c1, %c0_6, %c0_7] : memref<9x4x4xf32, #tpu.memory_space<vmem>>, vector<1x4x4xf32>
    %17 = vector.shape_cast %16 : vector<1x4x4xf32> to vector<4x4xf32>
    %cst_8 = arith.constant dense<0.000000e+00> : vector<64x4xf32>
    %18 = tpu.matmul %15, %17, %cst_8 {dimension_numbers = #tpu.dot_dimension_numbers<[1], [0], [0], [1], [0, 0, 1, 1], [], []>} : vector<64x4xf32>, vector<4x4xf32>, vector<64x4xf32> -> vector<64x4xf32>
    %19 = arith.addf %13, %18 : vector<64x4xf32>
    %20 = vector.extract_strided_slice %6 {offsets = [0, 2, 0], sizes = [4, 16, 4], strides = [1, 1, 1]} : vector<6x18x4xf32> to vector<4x16x4xf32>
    %21 = vector.shape_cast %20 : vector<4x16x4xf32> to vector<64x4xf32>
    %c2 = arith.constant 2 : index
    %c0_9 = arith.constant 0 : index
    %c0_10 = arith.constant 0 : index
    %22 = vector.load %arg5[%c2, %c0_9, %c0_10] : memref<9x4x4xf32, #tpu.memory_space<vmem>>, vector<1x4x4xf32>
    %23 = vector.shape_cast %22 : vector<1x4x4xf32> to vector<4x4xf32>
    %cst_11 = arith.constant dense<0.000000e+00> : vector<64x4xf32>
    %24 = tpu.matmul %21, %23, %cst_11 {dimension_numbers = #tpu.dot_dimension_numbers<[1], [0], [0], [1], [0, 0, 1, 1], [], []>} : vector<64x4xf32>, vector<4x4xf32>, vector<64x4xf32> -> vector<64x4xf32>
    %25 = arith.addf %19, %24 : vector<64x4xf32>
    %26 = vector.extract_strided_slice %6 {offsets = [1, 0, 0], sizes = [4, 16, 4], strides = [1, 1, 1]} : vector<6x18x4xf32> to vector<4x16x4xf32>
    %27 = vector.shape_cast %26 : vector<4x16x4xf32> to vector<64x4xf32>
    %c3 = arith.constant 3 : index
    %c0_12 = arith.constant 0 : index
    %c0_13 = arith.constant 0 : index
    %28 = vector.load %arg5[%c3, %c0_12, %c0_13] : memref<9x4x4xf32, #tpu.memory_space<vmem>>, vector<1x4x4xf32>
    %29 = vector.shape_cast %28 : vector<1x4x4xf32> to vector<4x4xf32>
    %cst_14 = arith.constant dense<0.000000e+00> : vector<64x4xf32>
    %30 = tpu.matmul %27, %29, %cst_14 {dimension_numbers = #tpu.dot_dimension_numbers<[1], [0], [0], [1], [0, 0, 1, 1], [], []>} : vector<64x4xf32>, vector<4x4xf32>, vector<64x4xf32> -> vector<64x4xf32>
    %31 = arith.addf %25, %30 : vector<64x4xf32>
    %32 = vector.extract_strided_slice %6 {offsets = [1, 1, 0], sizes = [4, 16, 4], strides = [1, 1, 1]} : vector<6x18x4xf32> to vector<4x16x4xf32>
    %33 = vector.shape_cast %32 : vector<4x16x4xf32> to vector<64x4xf32>
    %c4 = arith.constant 4 : index
    %c0_15 = arith.constant 0 : index
    %c0_16 = arith.constant 0 : index
    %34 = vector.load %arg5[%c4, %c0_15, %c0_16] : memref<9x4x4xf32, #tpu.memory_space<vmem>>, vector<1x4x4xf32>
    %35 = vector.shape_cast %34 : vector<1x4x4xf32> to vector<4x4xf32>
    %cst_17 = arith.constant dense<0.000000e+00> : vector<64x4xf32>
    %36 = tpu.matmul %33, %35, %cst_17 {dimension_numbers = #tpu.dot_dimension_numbers<[1], [0], [0], [1], [0, 0, 1, 1], [], []>} : vector<64x4xf32>, vector<4x4xf32>, vector<64x4xf32> -> vector<64x4xf32>
    %37 = arith.addf %31, %36 : vector<64x4xf32>
    %38 = vector.extract_strided_slice %6 {offsets = [1, 2, 0], sizes = [4, 16, 4], strides = [1, 1, 1]} : vector<6x18x4xf32> to vector<4x16x4xf32>
    %39 = vector.shape_cast %38 : vector<4x16x4xf32> to vector<64x4xf32>
    %c5 = arith.constant 5 : index
    %c0_18 = arith.constant 0 : index
    %c0_19 = arith.constant 0 : index
    %40 = vector.load %arg5[%c5, %c0_18, %c0_19] : memref<9x4x4xf32, #tpu.memory_space<vmem>>, vector<1x4x4xf32>
    %41 = vector.shape_cast %40 : vector<1x4x4xf32> to vector<4x4xf32>
    %cst_20 = arith.constant dense<0.000000e+00> : vector<64x4xf32>
    %42 = tpu.matmul %39, %41, %cst_20 {dimension_numbers = #tpu.dot_dimension_numbers<[1], [0], [0], [1], [0, 0, 1, 1], [], []>} : vector<64x4xf32>, vector<4x4xf32>, vector<64x4xf32> -> vector<64x4xf32>
    %43 = arith.addf %37, %42 : vector<64x4xf32>
    %44 = vector.extract_strided_slice %6 {offsets = [2, 0, 0], sizes = [4, 16, 4], strides = [1, 1, 1]} : vector<6x18x4xf32> to vector<4x16x4xf32>
    %45 = vector.shape_cast %44 : vector<4x16x4xf32> to vector<64x4xf32>
    %c6 = arith.constant 6 : index
    %c0_21 = arith.constant 0 : index
    %c0_22 = arith.constant 0 : index
    %46 = vector.load %arg5[%c6, %c0_21, %c0_22] : memref<9x4x4xf32, #tpu.memory_space<vmem>>, vector<1x4x4xf32>
    %47 = vector.shape_cast %46 : vector<1x4x4xf32> to vector<4x4xf32>
    %cst_23 = arith.constant dense<0.000000e+00> : vector<64x4xf32>
    %48 = tpu.matmul %45, %47, %cst_23 {dimension_numbers = #tpu.dot_dimension_numbers<[1], [0], [0], [1], [0, 0, 1, 1], [], []>} : vector<64x4xf32>, vector<4x4xf32>, vector<64x4xf32> -> vector<64x4xf32>
    %49 = arith.addf %43, %48 : vector<64x4xf32>
    %50 = vector.extract_strided_slice %6 {offsets = [2, 1, 0], sizes = [4, 16, 4], strides = [1, 1, 1]} : vector<6x18x4xf32> to vector<4x16x4xf32>
    %51 = vector.shape_cast %50 : vector<4x16x4xf32> to vector<64x4xf32>
    %c7 = arith.constant 7 : index
    %c0_24 = arith.constant 0 : index
    %c0_25 = arith.constant 0 : index
    %52 = vector.load %arg5[%c7, %c0_24, %c0_25] : memref<9x4x4xf32, #tpu.memory_space<vmem>>, vector<1x4x4xf32>
    %53 = vector.shape_cast %52 : vector<1x4x4xf32> to vector<4x4xf32>
    %cst_26 = arith.constant dense<0.000000e+00> : vector<64x4xf32>
    %54 = tpu.matmul %51, %53, %cst_26 {dimension_numbers = #tpu.dot_dimension_numbers<[1], [0], [0], [1], [0, 0, 1, 1], [], []>} : vector<64x4xf32>, vector<4x4xf32>, vector<64x4xf32> -> vector<64x4xf32>
    %55 = arith.addf %49, %54 : vector<64x4xf32>
    %56 = vector.extract_strided_slice %6 {offsets = [2, 2, 0], sizes = [4, 16, 4], strides = [1, 1, 1]} : vector<6x18x4xf32> to vector<4x16x4xf32>
    %57 = vector.shape_cast %56 : vector<4x16x4xf32> to vector<64x4xf32>
    %c8 = arith.constant 8 : index
    %c0_27 = arith.constant 0 : index
    %c0_28 = arith.constant 0 : index
    %58 = vector.load %arg5[%c8, %c0_27, %c0_28] : memref<9x4x4xf32, #tpu.memory_space<vmem>>, vector<1x4x4xf32>
    %59 = vector.shape_cast %58 : vector<1x4x4xf32> to vector<4x4xf32>
    %cst_29 = arith.constant dense<0.000000e+00> : vector<64x4xf32>
    %60 = tpu.matmul %57, %59, %cst_29 {dimension_numbers = #tpu.dot_dimension_numbers<[1], [0], [0], [1], [0, 0, 1, 1], [], []>} : vector<64x4xf32>, vector<4x4xf32>, vector<64x4xf32> -> vector<64x4xf32>
    %61 = arith.addf %55, %60 : vector<64x4xf32>
    %c0_30 = arith.constant 0 : index
    %c0_31 = arith.constant 0 : index
    %62 = vector.load %arg6[%c0_30, %c0_31] : memref<1x4xf32, #tpu.memory_space<vmem>>, vector<1x4xf32>
    %63 = vector.broadcast %62 : vector<1x4xf32> to vector<64x4xf32>
    %64 = arith.addf %61, %63 : vector<64x4xf32>
    %cst_32 = arith.constant 0.000000e+00 : f32
    %65 = vector.broadcast %cst_32 : f32 to vector<64x4xf32>
    %66 = arith.maximumf %64, %65 : vector<64x4xf32>
    %c0_33 = arith.constant 0 : index
    %c0_34 = arith.constant 0 : index
    %67 = vector.load %arg7[%c0_33, %c0_34] : memref<4x16xf32, #tpu.memory_space<vmem>>, vector<4x16xf32>
    %cst_35 = arith.constant dense<0.000000e+00> : vector<64x16xf32>
    %68 = tpu.matmul %66, %67, %cst_35 {dimension_numbers = #tpu.dot_dimension_numbers<[1], [0], [0], [1], [0, 0, 1, 1], [], []>} : vector<64x4xf32>, vector<4x16xf32>, vector<64x16xf32> -> vector<64x16xf32>
    %c0_36 = arith.constant 0 : index
    %c0_37 = arith.constant 0 : index
    %69 = vector.load %arg8[%c0_36, %c0_37] : memref<1x16xf32, #tpu.memory_space<vmem>>, vector<1x16xf32>
    %70 = vector.broadcast %69 : vector<1x16xf32> to vector<64x16xf32>
    %71 = arith.addf %68, %70 : vector<64x16xf32>
    %c1_i32 = arith.constant 1 : i32
    %72 = arith.addi %4, %c1_i32 : i32
    %c0_38 = arith.constant 0 : index
    %73 = arith.index_cast %72 : i32 to index
    %c0_39 = arith.constant 0 : index
    %c0_40 = arith.constant 0 : index
    %74 = vector.load %arg2[%c0_38, %73, %c0_39, %c0_40] : memref<1x18x18x4xf32, #tpu.memory_space<vmem>>, vector<1x4x18x4xf32>
    %75 = vector.shape_cast %74 : vector<1x4x18x4xf32> to vector<4x18x4xf32>
    %76 = vector.extract_strided_slice %75 {offsets = [0, 1, 0], sizes = [4, 16, 4], strides = [1, 1, 1]} : vector<4x18x4xf32> to vector<4x16x4xf32>
    %77 = vector.shape_cast %76 : vector<4x16x4xf32> to vector<64x4xf32>
    %c0_41 = arith.constant 0 : index
    %c0_42 = arith.constant 0 : index
    %78 = vector.load %arg9[%c0_41, %c0_42] : memref<4x16xf32, #tpu.memory_space<vmem>>, vector<4x16xf32>
    %cst_43 = arith.constant dense<0.000000e+00> : vector<64x16xf32>
    %79 = tpu.matmul %77, %78, %cst_43 {dimension_numbers = #tpu.dot_dimension_numbers<[1], [0], [0], [1], [0, 0, 1, 1], [], []>} : vector<64x4xf32>, vector<4x16xf32>, vector<64x16xf32> -> vector<64x16xf32>
    %80 = arith.addf %71, %79 : vector<64x16xf32>
    %cst_44 = arith.constant 0.000000e+00 : f32
    %81 = vector.broadcast %cst_44 : f32 to vector<64x16xf32>
    %82 = arith.maximumf %80, %81 : vector<64x16xf32>
    %83 = vector.shape_cast %82 : vector<64x16xf32> to vector<4x16x16xf32>
    %c0_45 = arith.constant 0 : index
    %c0_46 = arith.constant 0 : index
    %c0_47 = arith.constant 0 : index
    %c0_48 = arith.constant 0 : index
    %84 = vector.load %arg10[%c0_45, %c0_46, %c0_47, %c0_48] : memref<1x4x16x16xf32, #tpu.memory_space<vmem>>, vector<1x4x16x16xf32>
    %85 = vector.shape_cast %84 : vector<1x4x16x16xf32> to vector<4x16x16xf32>
    %86 = vector.shape_cast %83 : vector<4x16x16xf32> to vector<1x4x16x16xf32>
    tpu.vector_store %arg10[%c0_45, %c0_46, %c0_47, %c0_48], %86 {strides = array<i32>} : memref<1x4x16x16xf32, #tpu.memory_space<vmem>>, vector<1x4x16x16xf32>,
    return
  }
  func.func @transform_0(%arg0: i32, %arg1: i32) -> (i32, i32, i32, i32) {
    %c0_i32 = arith.constant 0 : i32
    %c0_i32_0 = arith.constant 0 : i32
    %c0_i32_1 = arith.constant 0 : i32
    %c0_i32_2 = arith.constant 0 : i32
    return %arg0, %c0_i32, %c0_i32_0, %c0_i32_1 : i32, i32, i32, i32
  }
  func.func @transform_1(%arg0: i32, %arg1: i32) -> (i32, i32) {
    %c0_i32 = arith.constant 0 : i32
    %c0_i32_0 = arith.constant 0 : i32
    %c0_i32_1 = arith.constant 0 : i32
    return %c0_i32, %c0_i32_0 : i32, i32
  }
  func.func @transform_2(%arg0: i32, %arg1: i32) -> (i32, i32) {
    %c0_i32 = arith.constant 0 : i32
    %c0_i32_0 = arith.constant 0 : i32
    %c0_i32_1 = arith.constant 0 : i32
    return %c0_i32, %c0_i32_0 : i32, i32
  }
  func.func @transform_3(%arg0: i32, %arg1: i32) -> (i32, i32, i32) {
    %c0_i32 = arith.constant 0 : i32
    %c0_i32_0 = arith.constant 0 : i32
    %c0_i32_1 = arith.constant 0 : i32
    %c0_i32_2 = arith.constant 0 : i32
    return %c0_i32, %c0_i32_0, %c0_i32_1 : i32, i32, i32
  }
  func.func @transform_4(%arg0: i32, %arg1: i32) -> (i32, i32) {
    %c0_i32 = arith.constant 0 : i32
    %c0_i32_0 = arith.constant 0 : i32
    %c0_i32_1 = arith.constant 0 : i32
    return %c0_i32, %c0_i32_0 : i32, i32
  }
  func.func @transform_5(%arg0: i32, %arg1: i32) -> (i32, i32) {
    %c0_i32 = arith.constant 0 : i32
    %c0_i32_0 = arith.constant 0 : i32
    %c0_i32_1 = arith.constant 0 : i32
    return %c0_i32, %c0_i32_0 : i32, i32
  }
  func.func @transform_6(%arg0: i32, %arg1: i32) -> (i32, i32) {
    %c0_i32 = arith.constant 0 : i32
    %c0_i32_0 = arith.constant 0 : i32
    %c0_i32_1 = arith.constant 0 : i32
    return %c0_i32, %c0_i32_0 : i32, i32
  }
  func.func @transform_7(%arg0: i32, %arg1: i32) -> (i32, i32) {
    %c0_i32 = arith.constant 0 : i32
    %c0_i32_0 = arith.constant 0 : i32
    %c0_i32_1 = arith.constant 0 : i32
    return %c0_i32, %c0_i32_0 : i32, i32
  }
  func.func @transform_8(%arg0: i32, %arg1: i32) -> (i32, i32, i32, i32) {
    %c0_i32 = arith.constant 0 : i32
    %c0_i32_0 = arith.constant 0 : i32
    %c0_i32_1 = arith.constant 0 : i32
    return %arg0, %arg1, %c0_i32, %c0_i32_0 : i32, i32, i32, i32
  }
}

</mosaic_0001>

<bundles_post_ra>
// kernel: tpu_custom_call.1
= control target key start
LH: loop header
LB: loop body
LE: loop exit
PB: predicated region body
PF: predicated region fallthrough
CT: control target
= control target key end

     0   :  { %13 = vsyncpa [#allocation4], 0  ;;  %s7890_s0 = inlined_call_operand.vmem [shape: f32[2,18,18,4], index: 0, kind: input, shape index: {}]   ;;  %s7891_s1 = inlined_call_operand.vmem [shape: f32[4,4], index: 1, kind: input, shape index: {}]   ;;  %s7892_s2 = inlined_call_operand.vmem [shape: f32[1,4], index: 2, kind: input, shape index: {}]   ;;  %s7893_s3 = inlined_call_operand.vmem [shape: f32[9,4,4], index: 3, kind: input, shape index: {}]   ;;  %s7894_s4 = inlined_call_operand.vmem [shape: f32[1,4], index: 4, kind: input, shape index: {}]   ;;  %s7895_s5 = inlined_call_operand.vmem [shape: f32[4,16], index: 5, kind: input, shape index: {}]   ;;  %s7896_s6 = inlined_call_operand.vmem [shape: f32[1,16], index: 6, kind: input, shape index: {}]   ;;  %s7897_s7 = inlined_call_operand.vmem [shape: f32[4,16], index: 7, kind: input, shape index: {}]   ;;  %s7898_s8 = inlined_call_operand.hbm [shape: f32[2,16,16,16], index: 8, kind: output, shape index: {}]  }
   0x1   :  { %15 = vsyncpa [#allocation4 + $0x1], 0  ;;  %s6561_s27 = smov 0   ;;  %s6563_s28 = smov 0  }
   0x2   :  { %s6565_s29 = smov 0   ;;  %s6567_s30 = smov 0  }
   0x3   :  { %s6569_s9 = smov 0   ;;  %s6571_s10 = smov 0  }
   0x4   :  { %s6573_s11 = smov 0   ;;  %s6575_s12 = smov 0  }
   0x5 LB: > { %s5594_s13 = sadd.s32 4294967295, %s6508_s12   ;;  %s5595_s14 = sadd.s32 4294967294, %s6508_s12   ;;  %s6508_s12 = sphi %s6575_s12, %s21_s12   ;;  %s6504_s11 = sphi %s6573_s11, %s7913_s11   ;;  %s6500_s10 = sphi %s6571_s10, %s7912_s10   ;;  %s6496_s9 = sphi %s6569_s9, %s7911_s9   ;;  %s6492_s30 = sphi %s6567_s30, %s7910_s30   ;;  %s6488_s29 = sphi %s6565_s29, %s7909_s29   ;;  %s6484_s28 = sphi %s6563_s28, %s7908_s28   ;;  %s6480_s27 = sphi %s6561_s27, %s7907_s27  }
   0x6   : > { %s30_s15 = sadd.s32 1, %s6500_s10  ;;  %s33_s16 = sadd.s32 1, %s6504_s11 }
   0x7   : > { %p31_p0 = scmp.ge.s32.totalorder %s30_s15, 4  ;;  %p225_p1 = scmp.ne.s32.totalorder %s6488_s29, %s6484_s28 }
   0x8   : > { %p226_p2 = scmp.eq.s32.totalorder %s5594_s13, 7  ;;  %p231_p5 = scmp.ne.s32.totalorder %s6484_s28, %s6480_s27 }
   0x9   : > { %s7915_s15 = smov (%p31_p0, %s30_s15), 0  ;;  %s7917_s16 = smov (!%p31_p0, %s33_s16), %s6504_s11 }
   0xa   : > { %7901 = sst [smem:[#allocation6_spill]] %s7915_s15  ;;  %s211_s17 = ssub.s32 %s6500_s10, %s7915_s15 }
   0xb   : > { %p6612_p3 = por %p226_p2, %p225_p1  ;;  %p35_p4 = scmp.ge.s32.totalorder %s7917_s16, 2 }
   0xc   : > { %p232_p6 = scmp.eq.s32.totalorder %s5595_s14, 7  ;;  %p5598_p7 = scmp.ge.s32.totalorder %s6508_s12, 1 }
   0xd   : > { %s7919_s16 = smov (%p35_p4, %s7917_s16), 0  ;;  %p279_p9 = scmp.lt.s32.totalorder %s6508_s12, 9 }
   0xe   : > { %7903 = sst [smem:[#allocation7_spill]] %s7919_s16  ;;  %p6621_p8 = por %p232_p6, %p231_p5 }
   0xf   : > { %s210_s20 = ssub.s32 %s6504_s11, %s7919_s16  ;;  %s215_s21 = sadd.s32 1, %s6488_s29 }
  0x10   : > { %s212_s22 = sor.u32 %s211_s17, %s210_s20  ;;  %p280_p10 = pnand %p5598_p7, %p279_p9 }
  0x11   : > { %p213_p11 = scmp.eq.s32.totalorder %s212_s22, 0  ;;  %s310_s24 = sand.u32 (!%p280_p10), 1, %s6484_s28  }
  0x12   : > { %283 = sbr.rel (%p280_p10) target bundleno = 951 (0x3b7), region = 52  ;;  %p313_p12 = scmp.lt.s32.totalorder (!%p280_p10), %s6496_s9, 1 }
  0x13   : > { %s6630_s23 = scalar_select %p213_p11, %s6488_s29, %s215_s21  }
  0x14   : > { %s5599_s25 = sshll.u32 (!%p280_p10), %s310_s24, 6  ;;  %p5601_p13 = scmp.ne.s32.totalorder (!%p280_p10), %s6492_s30, 0 }
  0x15   : > { %s6642_s17 = scalar_lea.vmem (!%p280_p10), [#allocation3], %s5599_s25 }
  0x19   : > { %s314_s26 = scalar_select %p313_p12, %s6496_s9, 1 }
  0x1a   : > { %322 = sbr.rel (%p5601_p13) target bundleno = 391 (0x187), region = 56  ;;  %v1169_v0 = vld [vmem:[%s7891_s1] sm:$0xf] (!%p5601_p13)  ;;  %vm1948_vm0 = vcmask (!%p5601_p13), 1043456   ;;  %v435_v1 = vlaneseq (!%p5601_p13)  ;;  %v6510_v2 = vmov (!%p5601_p13), 0.0   ;;  %vm6511_vm1 = vmmov (!%p5601_p13), 0  }
  0x1b   : > { %s6300_s13 = smul.u32 432, %s314_s26  ;;  %5937 = vmatprep.subr.mxu0 (!%p5601_p13), %v6510_v2  ;;  %5939 = vmatprep.mubr.msk.f32.mxu0 (!%p5601_p13), %vm6511_vm1, %v6510_v2  ;;  %vm1865_vm2 = vcmask (!%p5601_p13), 31744   ;;  %v6512_v5 = vmov (!%p5601_p13), 1983009808   ;;  %vm3862_vm3 = vcmask (!%p5601_p13), 25600  }
  0x1c   : > { %5938 = vmatpush3.msk.msra.mxu0 (!%p5601_p13), %vm1948_vm0, %v1169_v0  ;;  %v433_v6 = vunpack.c.l.s4 (!%p5601_p13), %v6512_v5  ;;  %v6654_v7 = vshrl.u32 (!%p5601_p13), %v435_v1, 7  ;;  %3860 = vst.msk [vmem:[#allocation2] sm:$0xff] (!%p5601_p13), %vm1865_vm2, %v6510_v2  ;;  %3861 = vst.msk [vmem:[#allocation2 + $0x8] sm:$0xff] (!%p5601_p13), %vm1865_vm2, %v6510_v2  ;;  %6216 = vmatprep.subr.mxu1 (!%p5601_p13), %v6510_v2 }
  0x1d   : > { %s6640_s16 = scalar_lea.vmem %s7890_s0, %s6300_s13  ;;  %3912 = vst.msk [vmem:[#allocation2 + $0x198] sm:$0xff] (!%p5601_p13), %vm1865_vm2, %v6510_v2  ;;  %3913 = vst.msk [vmem:[#allocation2 + $0x1a0] sm:$0xff] (!%p5601_p13), %vm1865_vm2, %v6510_v2  ;;  %6217 = vmatpush3.msk.msra.mxu1 (!%p5601_p13), %vm1948_vm0, %v1169_v0  ;;  %6002 = vmatprep.mubr.msk.f32.mxu1 (!%p5601_p13), %vm6511_vm1, %v6510_v2 }
  0x1e   : > { %v323_v3 = vld [vmem:[%s6640_s16] sm:$0xff] (!%p5601_p13)  ;;  %v324_v4 = vld [vmem:[%s6640_s16 + $0x8] sm:$0xff] (!%p5601_p13)  ;;  %v326_v8 = vld [vmem:[%s6640_s16 + $0x18] sm:$0xff] (!%p5601_p13)  ;;  %v434_v13 = vunpack.c.0.s8 (!%p5601_p13), %v433_v6  ;;  %3863 = vst.msk [vmem:[#allocation2 + $0x10] sm:$0x3] (!%p5601_p13), %vm3862_vm3, %v6510_v2  ;;  %vm2996_vm4 = vcmp.ge.s32.totalorder (!%p5601_p13), %v6654_v7, 1 }
  0x1f   : > { %v327_v9 = vld [vmem:[%s6640_s16 + $0x20] sm:$0xff] (!%p5601_p13)  ;;  %v6668_v10 = vld [vmem:[%s6640_s16 + $0xd8] sm:$0xff] (!%p5601_p13)  ;;  %v431_v12 = vcombine.high (!%p5601_p13), %v323_v3, %v323_v3  ;;  %v448_v14 = vcombine.high (!%p5601_p13), %v324_v4, %v324_v4  ;;  %v6675_v15 = vld [vmem:[%s6640_s16 + $0x30] sm:$0xff] (!%p5601_p13)  ;;  %v472_v16 = vcombine.high (!%p5601_p13), %v326_v8, %v326_v8  ;;  %3914 = vst.msk [vmem:[#allocation2 + $0x1a8] sm:$0x3] (!%p5601_p13), %vm3862_vm3, %v6510_v2 }
  0x20   : > { %v351_v11 = vld [vmem:[%s6640_s16 + $0xe0] sm:$0xff] (!%p5601_p13)  ;;  %v489_v17 = vcombine.high (!%p5601_p13), %v327_v9, %v327_v9  ;;  %v800_v18 = vcombine.high (!%p5601_p13), %v6668_v10, %v6668_v10  ;;  %v6680_v20 = vld [vmem:[%s6640_s16 + $0xf0] sm:$0xff] (!%p5601_p13)  ;;  %v6683_v21 = vld [vmem:[%s6640_s16 + $0x38] sm:$0xff] (!%p5601_p13)  ;;  %v6689_v23 = vsub.s32 (!%p5601_p13), %v434_v13, %v6654_v7  ;;  %v513_v24 = vcombine.high (!%p5601_p13), %v6675_v15, %v6675_v15 }
  0x21   : > { %v817_v19 = vcombine.high %v351_v11, %v351_v11  ;;  %v6686_v22 = vld [vmem:[%s6640_s16 + $0x48] sm:$0xff]  ;;  %v6694_v25 = vld [vmem:[%s6640_s16 + $0xf8] sm:$0xff]  ;;  %v841_v26 = vcombine.high %v6680_v20, %v6680_v20  ;;  %v530_v27 = vcombine.high %v6683_v21, %v6683_v21  ;;  %v6704_v29 = vld [vmem:[%s6640_s16 + $0x50] sm:$0xff] }
  0x22   : > { %v6701_v28 = vld [vmem:[%s6640_s16 + $0x108] sm:$0xff]  ;;  %v858_v30 = vcombine.high %v6694_v25, %v6694_v25  ;;  %v554_v31 = vcombine.high %v6686_v22, %v6686_v22  ;;  %v571_v33 = vcombine.high %v6704_v29, %v6704_v29  ;;  %v438_v34 = vrot.slane %v323_v3, %v6689_v23  ;;  %v5602_v38 = vld.sshfl [vmem:[%s6640_s16 + $0x10] sm:$0x3 pattern:$0x76325410] }
  0x23   : > { %v882_v32 = vcombine.high %v6701_v28, %v6701_v28  ;;  %v445_v35 = vrot.slane %v431_v12, %v6689_v23  ;;  %v455_v36 = vrot.slane %v324_v4, %v6689_v23  ;;  %v462_v37 = vrot.slane %v448_v14, %v6689_v23 }
  0x24   : > { %v479_v39 = vrot.slane %v326_v8, %v6689_v23  ;;  %v486_v40 = vrot.slane %v472_v16, %v6689_v23  ;;  %v496_v41 = vrot.slane %v327_v9, %v6689_v23  ;;  %v503_v42 = vrot.slane %v489_v17, %v6689_v23  ;;  %v5603_v9 = vld.sshfl [vmem:[%s6640_s16 + $0x28] sm:$0x3 pattern:$0x76325410] }
  0x25   : > { %v446_v43 = vcombine.high %v438_v34, %v438_v34  ;;  %v447_v44 = vcombine.high %v445_v35, %v445_v35  ;;  %v463_v45 = vcombine.high %v455_v36, %v455_v36  ;;  %v464_v46 = vcombine.high %v462_v37, %v462_v37  ;;  %v5611_v17 = vld.sshfl [vmem:[%s6640_s16 + $0xe8] sm:$0x3 pattern:$0x76325410] }
  0x26   : > { %v487_v47 = vcombine.high %v479_v39, %v479_v39  ;;  %v1211_v48 = vcombine.low %v5602_v38, %v479_v39  ;;  %v488_v49 = vcombine.high %v486_v40, %v486_v40  ;;  %v504_v50 = vcombine.high %v496_v41, %v496_v41 }
  0x27   : > { %v1177_v51 = vcombine.low %v438_v34, %v446_v43  ;;  %v1178_v52 = vcombine.low %v445_v35, %v447_v44  ;;  %v1194_v53 = vcombine.low %v455_v36, %v463_v45  ;;  %v1195_v54 = vcombine.low %v462_v37, %v464_v46 }
  0x28   : > { %v1212_v55 = vcombine.low %v487_v47, %v486_v40  ;;  %v1219_v56 = vrot.slane %v1211_v48, %v6689_v23  ;;  %v1228_v57 = vcombine.low %v488_v49, %v496_v41  ;;  %v1229_v58 = vcombine.low %v504_v50, %v503_v42 }
  0x29   : > { %v1185_v59 = vrot.slane %v1177_v51, %v6689_v23  ;;  %v1192_v60 = vrot.slane %v1178_v52, %v6689_v23  ;;  %v1202_v61 = vrot.slane %v1194_v53, %v6689_v23  ;;  %v1209_v62 = vrot.slane %v1195_v54, %v6689_v23 }
  0x2a   : > { %v1226_v63 = vrot.slane %v1212_v55, %v6689_v23  ;;  %v1236_v0 = vrot.slane %v1228_v57, %v6689_v23  ;;  %v1243_v1 = vrot.slane %v1229_v58, %v6689_v23  ;;  %v6732_v3 = vrot.slane %v800_v18, %v6689_v23 }
  0x2b   : > { %v1193_v4 = vcombine.low %v1185_v59, %v1192_v60  ;;  %v1210_v5 = vcombine.low %v1202_v61, %v1209_v62  ;;  %v824_v6 = vrot.slane %v351_v11, %v6689_v23  ;;  %v831_v8 = vrot.slane %v817_v19, %v6689_v23 }
  0x2c   : > { %v1227_v12 = vcombine.low %v1219_v56, %v1226_v63  ;;  %v1244_v13 = vcombine.low %v1236_v0, %v1243_v1  ;;  %v816_v14 = vcombine.high %v6732_v3, %v6732_v3  ;;  %v505_v16 = vcombine.high %v503_v42, %v503_v42  ;;  %v5604_v63 = vld.sshfl [vmem:[%s6640_s16 + $0x40] sm:$0x3 pattern:$0x76325410] }
  0x2d   : > { %5940 = vmatmul.mubr.msk.f32.vlgmr.msra.gmra.mrb[0].mxu0 %vm1865_vm2, %v1193_v4  ;;  %v832_v34 = vcombine.high %v824_v6, %v824_v6  ;;  %v520_v18 = vrot.slane %v6675_v15, %v6689_v23  ;;  %v833_v35 = vcombine.high %v831_v8, %v831_v8  ;;  %v848_v11 = vrot.slane %v6680_v20, %v6689_v23  ;;  %v5612_v4 = vld.sshfl [vmem:[%s6640_s16 + $0x100] sm:$0x3 pattern:$0x76325410] }
  0x2e   : > { %5942 = vmatprep.mubr.msk.f32.mxu0 %vm6511_vm1, %v6510_v2  ;;  %v1534_v19 = vcombine.low %v816_v14, %v824_v6  ;;  %v1245_v36 = vcombine.low %v505_v16, %v5603_v9  ;;  %v527_v37 = vrot.slane %v513_v24, %v6689_v23  ;;  %v537_v38 = vrot.slane %v6683_v21, %v6689_v23 }
  0x2f   : > { %v1535_v39 = vcombine.low %v832_v34, %v831_v8  ;;  %v528_v40 = vcombine.high %v520_v18, %v520_v18  ;;  %v856_v41 = vcombine.high %v848_v11, %v848_v11  ;;  %v1551_v42 = vcombine.low %v833_v35, %v5611_v17  ;;  %v357_v17 = vld [vmem:[%s6640_s16 + $0x110] sm:$0xff] }
  0x30   : > { %v1542_v15 = vrot.slane %v1534_v19, %v6689_v23  ;;  %v1253_v43 = vrot.slane %v1245_v36, %v6689_v23  ;;  %v529_v44 = vcombine.high %v527_v37, %v527_v37  ;;  %v545_v45 = vcombine.high %v537_v38, %v537_v38 }
  0x31   : > { %5943 = vmatmul.mubr.msk.f32.gmra.mrb[2].mxu0 %vm1865_vm2, %v1210_v5  ;;  %v1549_v46 = vrot.slane %v1535_v39, %v6689_v23  ;;  %v1246_v47 = vcombine.low %v520_v18, %v528_v40  ;;  %v1552_v48 = vcombine.low %v848_v11, %v856_v41  ;;  %v1559_v24 = vrot.slane %v1551_v42, %v6689_v23 }
  0x32   : > { %5945 = vmatprep.mubr.msk.f32.mxu0 %vm6511_vm1, %v6510_v2  ;;  %v1262_v49 = vcombine.low %v527_v37, %v529_v44  ;;  %v1263_v50 = vcombine.low %v537_v38, %v545_v45  ;;  %v855_v51 = vrot.slane %v841_v26, %v6689_v23  ;;  %v865_v52 = vrot.slane %v6694_v25, %v6689_v23 }
  0x33   : > { %v1550_v53 = vcombine.low %v1542_v15, %v1549_v46  ;;  %v1260_v54 = vrot.slane %v1246_v47, %v6689_v23  ;;  %v1566_v55 = vrot.slane %v1552_v48, %v6689_v23  ;;  %v544_v56 = vrot.slane %v530_v27, %v6689_v23  ;;  %v335_v46 = vld [vmem:[%s6640_s16 + $0x60] sm:$0xff] }
  0x34   : > { %v1270_v57 = vrot.slane %v1262_v49, %v6689_v23  ;;  %v1277_v58 = vrot.slane %v1263_v50, %v6689_v23  ;;  %v857_v20 = vcombine.high %v855_v51, %v855_v51  ;;  %v873_v26 = vcombine.high %v865_v52, %v865_v52 }
  0x35   : > { %5946 = vmatmul.mubr.msk.f32.gmra.mrb[4].mxu0 %vm1865_vm2, %v1227_v12  ;;  %6003 = vmatmul.mubr.msk.f32.vlgmr.msra.gmra.mrb[0].mxu1 %vm1865_vm2, %v1550_v53  ;;  %v1261_v59 = vcombine.low %v1253_v43, %v1260_v54  ;;  %v1567_v60 = vcombine.low %v1559_v24, %v1566_v55  ;;  %v546_v61 = vcombine.high %v544_v56, %v544_v56  ;;  %v5605_v24 = vld.sshfl [vmem:[%s6640_s16 + $0x58] sm:$0x3 pattern:$0x76325410] }
  0x36   : > { %5948 = vmatprep.mubr.msk.f32.mxu0 %vm6511_vm1, %v6510_v2  ;;  %6005 = vmatprep.mubr.msk.f32.mxu1 %vm6511_vm1, %v6510_v2  ;;  %v1278_v21 = vcombine.low %v1270_v57, %v1277_v58  ;;  %v1568_v27 = vcombine.low %v855_v51, %v857_v20  ;;  %v1569_v62 = vcombine.low %v865_v52, %v873_v26  ;;  %v359_v51 = vld [vmem:[%s6640_s16 + $0x120] sm:$0xff]  ;;  %v5613_v58 = vld.sshfl [vmem:[%s6640_s16 + $0x118] sm:$0x3 pattern:$0x76325410] }
  0x37   : > { %v561_v0 = vrot.slane %v6686_v22, %v6689_v23  ;;  %v1279_v1 = vcombine.low %v544_v56, %v546_v61  ;;  %v872_v5 = vrot.slane %v858_v30, %v6689_v23  ;;  %v889_v6 = vrot.slane %v6701_v28, %v6689_v23 }
  0x38   : > { %v1576_v8 = vrot.slane %v1568_v27, %v6689_v23  ;;  %v1583_v9 = vrot.slane %v1569_v62, %v6689_v23  ;;  %v568_v12 = vrot.slane %v554_v31, %v6689_v23  ;;  %v578_v14 = vrot.slane %v6704_v29, %v6689_v23 }
  0x39   : > { %5949 = vmatmul.mubr.msk.f32.gmra.mrb[6].mxu0 %vm1865_vm2, %v1244_v13  ;;  %6006 = vmatmul.mubr.msk.f32.gmra.mrb[2].mxu1 %vm1865_vm2, %v1567_v60  ;;  %v1280_v25 = vcombine.low %v5604_v63, %v561_v0  ;;  %v1287_v30 = vrot.slane %v1279_v1, %v6689_v23  ;;  %v874_v16 = vcombine.high %v872_v5, %v872_v5  ;;  %v336_v1 = vld [vmem:[%s6640_s16 + $0x68] sm:$0xff] }
  0x3a   : > { %5951 = vmatprep.mubr.msk.f32.mxu0 %vm6511_vm1, %v6510_v2  ;;  %6008 = vmatprep.mubr.msk.f32.mxu1 %vm6511_vm1, %v6510_v2  ;;  %v1584_v22 = vcombine.low %v1576_v8, %v1583_v9  ;;  %v1586_v31 = vcombine.low %v5612_v4, %v889_v6  ;;  %v569_v34 = vcombine.high %v561_v0, %v561_v0  ;;  %v360_v8 = vld [vmem:[%s6640_s16 + $0x128] sm:$0xff] }
  0x3b   : > { %v1294_v18 = vrot.slane %v1280_v25, %v6689_v23  ;;  %v1585_v35 = vcombine.low %v872_v5, %v874_v16  ;;  %v570_v13 = vcombine.high %v568_v12, %v568_v12  ;;  %v896_v11 = vrot.slane %v882_v32, %v6689_v23 }
  0x3c   : > { %v1600_v19 = vrot.slane %v1586_v31, %v6689_v23  ;;  %v1296_v36 = vcombine.low %v569_v34, %v568_v12  ;;  %v897_v37 = vcombine.high %v889_v6, %v889_v6  ;;  %v906_v38 = vrot.slane %v357_v17, %v6689_v23 }
  0x3d   : > { %5952 = vmatmul.mubr.msk.f32.gmra.mrb[8].mxu0 %vm1865_vm2, %v1261_v59  ;;  %6009 = vmatmul.mubr.msk.f32.gmra.mrb[4].mxu1 %vm1865_vm2, %v1584_v22  ;;  %v1295_v39 = vcombine.low %v1287_v30, %v1294_v18  ;;  %v1593_v40 = vrot.slane %v1585_v35, %v6689_v23  ;;  %v1297_v41 = vcombine.low %v570_v13, %v578_v14  ;;  %v338_v13 = vld [vmem:[%s6640_s16 + $0x78] sm:$0xff] }
  0x3e   : > { %5954 = vmatprep.mubr.msk.f32.mxu0 %vm6511_vm1, %v6510_v2  ;;  %6011 = vmatprep.mubr.msk.f32.mxu1 %vm6511_vm1, %v6510_v2  ;;  %v1304_v28 = vrot.slane %v1296_v36, %v6689_v23  ;;  %v898_v32 = vcombine.high %v896_v11, %v896_v11  ;;  %v1602_v42 = vcombine.low %v897_v37, %v896_v11 }
  0x3f   : > { %v1601_v15 = vcombine.low %v1593_v40, %v1600_v19  ;;  %v1311_v43 = vrot.slane %v1297_v41, %v6689_v23  ;;  %v585_v44 = vrot.slane %v571_v33, %v6689_v23  ;;  %v586_v45 = vcombine.high %v578_v14, %v578_v14 }
  0x40   : > { %v1603_v47 = vcombine.low %v898_v32, %v906_v38  ;;  %v1610_v48 = vrot.slane %v1602_v42, %v6689_v23  ;;  %v899_v49 = vcombine.high %v357_v17, %v357_v17  ;;  %v914_v50 = vcombine.high %v906_v38, %v906_v38 }
  0x41   : > { %5955 = vmatmul.mubr.msk.f32.gmra.mrb[10].mxu0 %vm1865_vm2, %v1278_v21  ;;  %6012 = vmatmul.mubr.msk.f32.gmra.mrb[6].mxu1 %vm1865_vm2, %v1601_v15  ;;  %v1312_v52 = vcombine.low %v1304_v28, %v1311_v43  ;;  %v587_v53 = vcombine.high %v585_v44, %v585_v44  ;;  %v1313_v54 = vcombine.low %v586_v45, %v585_v44  ;;  %v362_v43 = vld [vmem:[%s6640_s16 + $0x138] sm:$0xff] }
  0x42   : > { %5957 = vmatprep.mubr.msk.f32.mxu0 %vm6511_vm1, %v6510_v2  ;;  %6014 = vmatprep.mubr.msk.f32.mxu1 %vm6511_vm1, %v6510_v2  ;;  %v1617_v29 = vrot.slane %v1603_v47, %v6689_v23  ;;  %v913_v33 = vrot.slane %v899_v49, %v6689_v23  ;;  %v595_v55 = vcombine.high %v335_v46, %v335_v46  ;;  %v5606_v47 = vld.sshfl [vmem:[%s6640_s16 + $0x70] sm:$0x3 pattern:$0x76325410] }
  0x43   : > { %v1314_v56 = vcombine.low %v587_v53, %v5605_v24  ;;  %v1321_v57 = vrot.slane %v1313_v54, %v6689_v23  ;;  %v602_v20 = vrot.slane %v335_v46, %v6689_v23  ;;  %v923_v26 = vcombine.high %v359_v51, %v359_v51 }
  0x44   : > { %v1618_v59 = vcombine.low %v1610_v48, %v1617_v29  ;;  %v915_v60 = vcombine.high %v913_v33, %v913_v33  ;;  %v1619_v61 = vcombine.low %v914_v50, %v913_v33  ;;  %v609_v21 = vrot.slane %v595_v55, %v6689_v23 }
  0x45   : > { %5958 = vmatmul.mubr.msk.f32.gmra.mrb[12].mxu0 %vm1865_vm2, %v1295_v39  ;;  %v1328_v27 = vrot.slane %v1314_v56, %v6689_v23  ;;  %v610_v62 = vcombine.high %v602_v20, %v602_v20  ;;  %v930_v63 = vrot.slane %v359_v51, %v6689_v23  ;;  %v937_v0 = vrot.slane %v923_v26, %v6689_v23  ;;  %v5614_v56 = vld.sshfl [vmem:[%s6640_s16 + $0x130] sm:$0x3 pattern:$0x76325410] }
  0x46   : > { %5960 = vmatprep.mubr.msk.f32.mxu0 %vm6511_vm1, %v6510_v2  ;;  %6015 = vmatmul.mubr.msk.f32.gmra.mrb[8].mxu1 %vm1865_vm2, %v1618_v59  ;;  %v1620_v4 = vcombine.low %v915_v60, %v5613_v58  ;;  %v1627_v5 = vrot.slane %v1619_v61, %v6689_v23  ;;  %v611_v6 = vcombine.high %v609_v21, %v609_v21  ;;  %v363_v60 = vld [vmem:[%s6640_s16 + $0x140] sm:$0xff] }
  0x47   : > { %v1329_v9 = vcombine.low %v1321_v57, %v1328_v27  ;;  %6017 = vmatprep.mubr.msk.f32.mxu1 %vm6511_vm1, %v6510_v2  ;;  %v1330_v12 = vcombine.low %v602_v20, %v610_v62  ;;  %v938_v14 = vcombine.high %v930_v63, %v930_v63  ;;  %v939_v25 = vcombine.high %v937_v0, %v937_v0  ;;  %v339_v57 = vld [vmem:[%s6640_s16 + $0x80] sm:$0xff] }
  0x48   : > { %v1634_v30 = vrot.slane %v1620_v4, %v6689_v23  ;;  %v1331_v16 = vcombine.low %v609_v21, %v611_v6  ;;  %v612_v17 = vcombine.high %v336_v1, %v336_v1  ;;  %v619_v22 = vrot.slane %v336_v1, %v6689_v23 }
  0x49   : > { %5961 = vmatmul.mubr.msk.f32.gmra.mrb[14].mxu0 %vm1865_vm2, %v1312_v52  ;;  %v1338_v31 = vrot.slane %v1330_v12, %v6689_v23  ;;  %v1636_v34 = vcombine.low %v930_v63, %v938_v14  ;;  %v1637_v18 = vcombine.low %v937_v0, %v939_v25  ;;  %v940_v35 = vcombine.high %v360_v8, %v360_v8 }
  0x4a   : > { %5963 = vmatprep.mubr.msk.f32.mxu0 %vm6511_vm1, %v6510_v2  ;;  %v1635_v11 = vcombine.low %v1627_v5, %v1634_v30  ;;  %v1345_v19 = vrot.slane %v1331_v16, %v6689_v23  ;;  %v626_v36 = vrot.slane %v612_v17, %v6689_v23  ;;  %v627_v37 = vcombine.high %v619_v22, %v619_v22  ;;  %v341_v30 = vld [vmem:[%s6640_s16 + $0x90] sm:$0xff] }
  0x4b   : > { %v1644_v38 = vrot.slane %v1636_v34, %v6689_v23  ;;  %v1651_v39 = vrot.slane %v1637_v18, %v6689_v23  ;;  %v947_v40 = vrot.slane %v360_v8, %v6689_v23  ;;  %v954_v41 = vrot.slane %v940_v35, %v6689_v23  ;;  %v365_v16 = vld [vmem:[%s6640_s16 + $0x150] sm:$0xff]  ;;  %v5607_v34 = vld.sshfl [vmem:[%s6640_s16 + $0x88] sm:$0x3 pattern:$0x76325410] }
  0x4c   : > { %6018 = vmatmul.mubr.msk.f32.gmra.mrb[10].mxu1 %vm1865_vm2, %v1635_v11  ;;  %v1346_v28 = vcombine.low %v1338_v31, %v1345_v19  ;;  %v628_v32 = vcombine.high %v626_v36, %v626_v36  ;;  %v1347_v42 = vcombine.low %v619_v22, %v627_v37  ;;  %v636_v15 = vcombine.high %v338_v13, %v338_v13 }
  0x4d   : > { %5964 = vmatmul.mubr.msk.f32.gmra.mrb[16].mxu0 %vm1865_vm2, %v1329_v9  ;;  %6020 = vmatprep.mubr.msk.f32.mxu1 %vm6511_vm1, %v6510_v2  ;;  %v1652_v44 = vcombine.low %v1644_v38, %v1651_v39  ;;  %v955_v45 = vcombine.high %v947_v40, %v947_v40  ;;  %v956_v46 = vcombine.high %v954_v41, %v954_v41 }
  0x4e   : > { %5966 = vmatprep.mubr.msk.f32.mxu0 %vm6511_vm1, %v6510_v2  ;;  %v1348_v48 = vcombine.low %v626_v36, %v628_v32  ;;  %v1355_v24 = vrot.slane %v1347_v42, %v6689_v23  ;;  %v643_v49 = vrot.slane %v338_v13, %v6689_v23  ;;  %v650_v50 = vrot.slane %v636_v15, %v6689_v23  ;;  %v5615_v32 = vld.sshfl [vmem:[%s6640_s16 + $0x148] sm:$0x3 pattern:$0x76325410] }
  0x4f   : > { %v1653_v51 = vcombine.low %v947_v40, %v955_v45  ;;  %v1654_v52 = vcombine.low %v954_v41, %v956_v46  ;;  %v964_v53 = vcombine.high %v362_v43, %v362_v43  ;;  %v971_v54 = vrot.slane %v362_v43, %v6689_v23  ;;  %v366_v45 = vld [vmem:[%s6640_s16 + $0x158] sm:$0xff] }
  0x50   : > { %6021 = vmatmul.mubr.msk.f32.gmra.mrb[12].mxu1 %vm1865_vm2, %v1652_v44  ;;  %v1362_v29 = vrot.slane %v1348_v48, %v6689_v23  ;;  %v651_v33 = vcombine.high %v643_v49, %v643_v49  ;;  %v1364_v55 = vcombine.low %v5606_v47, %v643_v49  ;;  %v652_v58 = vcombine.high %v650_v50, %v650_v50  ;;  %v342_v44 = vld [vmem:[%s6640_s16 + $0x98] sm:$0xff] }
  0x51   : > { %5967 = vmatmul.mubr.msk.f32.gmra.mrb[18].mxu0 %vm1865_vm2, %v1346_v28  ;;  %6023 = vmatprep.mubr.msk.f32.mxu1 %vm6511_vm1, %v6510_v2  ;;  %v1661_v20 = vrot.slane %v1653_v51, %v6689_v23  ;;  %v1668_v26 = vrot.slane %v1654_v52, %v6689_v23  ;;  %v978_v59 = vrot.slane %v964_v53, %v6689_v23 }
  0x52   : > { %5969 = vmatprep.mubr.msk.f32.mxu0 %vm6511_vm1, %v6510_v2  ;;  %v1363_v61 = vcombine.low %v1355_v24, %v1362_v29  ;;  %v1365_v21 = vcombine.low %v651_v33, %v650_v50  ;;  %v1372_v27 = vrot.slane %v1364_v55, %v6689_v23  ;;  %v979_v62 = vcombine.high %v971_v54, %v971_v54 }
  0x53   : > { %v1669_v63 = vcombine.low %v1661_v20, %v1668_v26  ;;  %v1670_v0 = vcombine.low %v5614_v56, %v971_v54  ;;  %v653_v1 = vcombine.high %v339_v57, %v339_v57  ;;  %v660_v4 = vrot.slane %v339_v57, %v6689_v23  ;;  %v344_v20 = vld [vmem:[%s6640_s16 + $0xa8] sm:$0xff] }
  0x54   : > { %v1379_v5 = vrot.slane %v1365_v21, %v6689_v23  ;;  %v1671_v6 = vcombine.low %v979_v62, %v978_v59  ;;  %v980_v8 = vcombine.high %v978_v59, %v978_v59  ;;  %v981_v9 = vcombine.high %v363_v60, %v363_v60 }
  0x55   : > { %5970 = vmatmul.mubr.msk.f32.gmra.mrb[20].mxu0 %vm1865_vm2, %v1363_v61  ;;  %6024 = vmatmul.mubr.msk.f32.gmra.mrb[14].mxu1 %vm1865_vm2, %v1669_v63  ;;  %v1678_v12 = vrot.slane %v1670_v0, %v6689_v23  ;;  %v667_v14 = vrot.slane %v653_v1, %v6689_v23  ;;  %v668_v25 = vcombine.high %v660_v4, %v660_v4  ;;  %v5608_v63 = vld.sshfl [vmem:[%s6640_s16 + $0xa0] sm:$0x3 pattern:$0x76325410] }
  0x56   : > { %5972 = vmatprep.mubr.msk.f32.mxu0 %vm6511_vm1, %v6510_v2  ;;  %v1380_v17 = vcombine.low %v1372_v27, %v1379_v5  ;;  %6026 = vmatprep.mubr.msk.f32.mxu1 %vm6511_vm1, %v6510_v2  ;;  %v1685_v22 = vrot.slane %v1671_v6, %v6689_v23  ;;  %v1381_v31 = vcombine.low %v652_v58, %v660_v4 }
  0x57   : > { %v1382_v18 = vcombine.low %v668_v25, %v667_v14  ;;  %v988_v35 = vrot.slane %v363_v60, %v6689_v23  ;;  %v995_v13 = vrot.slane %v981_v9, %v6689_v23  ;;  %v669_v11 = vcombine.high %v667_v14, %v667_v14 }
  0x58   : > { %v1686_v19 = vcombine.low %v1678_v12, %v1685_v22  ;;  %v1389_v36 = vrot.slane %v1381_v31, %v6689_v23  ;;  %v684_v37 = vrot.slane %v341_v30, %v6689_v23  ;;  %v1012_v38 = vrot.slane %v365_v16, %v6689_v23  ;;  %v5616_v22 = vld.sshfl [vmem:[%s6640_s16 + $0x160] sm:$0x3 pattern:$0x76325410] }
  0x59   : > { %5973 = vmatmul.mubr.msk.f32.gmra.mrb[22].mxu0 %vm1865_vm2, %v1380_v17  ;;  %v1396_v39 = vrot.slane %v1382_v18, %v6689_v23  ;;  %v996_v40 = vcombine.high %v988_v35, %v988_v35  ;;  %v1687_v41 = vcombine.low %v980_v8, %v988_v35  ;;  %v1398_v28 = vcombine.low %v669_v11, %v5607_v34  ;;  %v368_v8 = vld [vmem:[%s6640_s16 + $0x168] sm:$0xff] }
  0x5a   : > { %6027 = vmatmul.mubr.msk.f32.gmra.mrb[16].mxu1 %vm1865_vm2, %v1686_v19  ;;  %5975 = vmatprep.mubr.msk.f32.mxu0 %vm6511_vm1, %v6510_v2  ;;  %v692_v42 = vcombine.high %v684_v37, %v684_v37  ;;  %v997_v15 = vcombine.high %v995_v13, %v995_v13  ;;  %v1020_v43 = vcombine.high %v1012_v38, %v1012_v38 }
  0x5b   : > { %v1397_v46 = vcombine.low %v1389_v36, %v1396_v39  ;;  %6029 = vmatprep.mubr.msk.f32.mxu1 %vm6511_vm1, %v6510_v2  ;;  %v1688_v47 = vcombine.low %v996_v40, %v995_v13  ;;  %v1695_v48 = vrot.slane %v1687_v41, %v6689_v23  ;;  %v1406_v24 = vrot.slane %v1398_v28, %v6689_v23  ;;  %v345_v13 = vld [vmem:[%s6640_s16 + $0xb0] sm:$0xff] }
  0x5c   : > { %v1399_v49 = vcombine.low %v684_v37, %v692_v42  ;;  %v1704_v50 = vcombine.low %v997_v15, %v5615_v32  ;;  %v1705_v51 = vcombine.low %v1012_v38, %v1020_v43  ;;  %v677_v52 = vcombine.high %v341_v30, %v341_v30  ;;  %v369_v15 = vld [vmem:[%s6640_s16 + $0x170] sm:$0xff] }
  0x5d   : > { %5976 = vmatmul.mubr.msk.f32.gmra.mrb[24].mxu0 %vm1865_vm2, %v1397_v46  ;;  %v1702_v53 = vrot.slane %v1688_v47, %v6689_v23  ;;  %v701_v54 = vrot.slane %v342_v44, %v6689_v23  ;;  %v1005_v29 = vcombine.high %v365_v16, %v365_v16  ;;  %v1029_v33 = vrot.slane %v366_v45, %v6689_v23 }
  0x5e   : > { %5978 = vmatprep.mubr.msk.f32.mxu0 %vm6511_vm1, %v6510_v2  ;;  %v1413_v55 = vrot.slane %v1399_v49, %v6689_v23  ;;  %v1712_v56 = vrot.slane %v1704_v50, %v6689_v23  ;;  %v1719_v57 = vrot.slane %v1705_v51, %v6689_v23  ;;  %v691_v58 = vrot.slane %v677_v52, %v6689_v23 }
  0x5f   : > { %v1703_v26 = vcombine.low %v1695_v48, %v1702_v53  ;;  %v709_v59 = vcombine.high %v701_v54, %v701_v54  ;;  %v1019_v60 = vrot.slane %v1005_v29, %v6689_v23  ;;  %v1037_v61 = vcombine.high %v1029_v33, %v1029_v33 }
  0x60   : > { %v1414_v21 = vcombine.low %v1406_v24, %v1413_v55  ;;  %v1720_v27 = vcombine.low %v1712_v56, %v1719_v57  ;;  %v693_v62 = vcombine.high %v691_v58, %v691_v58  ;;  %v694_v0 = vcombine.high %v342_v44, %v342_v44  ;;  %v347_v56 = vld [vmem:[%s6640_s16 + $0xc0] sm:$0xff] }
  0x61   : > { %6030 = vmatmul.mubr.msk.f32.gmra.mrb[18].mxu1 %vm1865_vm2, %v1703_v26  ;;  %v1416_v1 = vcombine.low %v701_v54, %v709_v59  ;;  %v1021_v4 = vcombine.high %v1019_v60, %v1019_v60  ;;  %v1722_v5 = vcombine.low %v1029_v33, %v1037_v61  ;;  %v725_v6 = vrot.slane %v344_v20, %v6689_v23  ;;  %v371_v59 = vld [vmem:[%s6640_s16 + $0x180] sm:$0xff] }
  0x62   : > { %5979 = vmatmul.mubr.msk.f32.gmra.mrb[26].mxu0 %vm1865_vm2, %v1414_v21  ;;  %6032 = vmatprep.mubr.msk.f32.mxu1 %vm6511_vm1, %v6510_v2  ;;  %v1415_v9 = vcombine.low %v691_v58, %v693_v62  ;;  %v708_v12 = vrot.slane %v694_v0, %v6689_v23  ;;  %v1022_v14 = vcombine.high %v366_v45, %v366_v45 }
  0x63   : > { %5981 = vmatprep.mubr.msk.f32.mxu0 %vm6511_vm1, %v6510_v2  ;;  %v1430_v25 = vrot.slane %v1416_v1, %v6689_v23  ;;  %v1721_v30 = vcombine.low %v1019_v60, %v1021_v4  ;;  %v1736_v16 = vrot.slane %v1722_v5, %v6689_v23  ;;  %v1433_v17 = vcombine.low %v5608_v63, %v725_v6 }
  0x64   : > { %v1423_v31 = vrot.slane %v1415_v9, %v6689_v23  ;;  %v710_v34 = vcombine.high %v708_v12, %v708_v12  ;;  %v1036_v18 = vrot.slane %v1022_v14, %v6689_v23  ;;  %v1053_v35 = vrot.slane %v368_v8, %v6689_v23 }
  0x65   : > { %6033 = vmatmul.mubr.msk.f32.gmra.mrb[20].mxu1 %vm1865_vm2, %v1720_v27  ;;  %v1729_v11 = vrot.slane %v1721_v30, %v6689_v23  ;;  %v1447_v19 = vrot.slane %v1433_v17, %v6689_v23  ;;  %v718_v36 = vcombine.high %v344_v20, %v344_v20  ;;  %v733_v37 = vcombine.high %v725_v6, %v725_v6  ;;  %v5609_v27 = vld.sshfl [vmem:[%s6640_s16 + $0xb8] sm:$0x3 pattern:$0x76325410]  ;;  %v348_v17 = vld [vmem:[%s6640_s16 + $0xc8] sm:$0xff] }
  0x66   : > { %v1431_v38 = vcombine.low %v1423_v31, %v1430_v25  ;;  %6035 = vmatprep.mubr.msk.f32.mxu1 %vm6511_vm1, %v6510_v2  ;;  %v1432_v39 = vcombine.low %v708_v12, %v710_v34  ;;  %v1038_v40 = vcombine.high %v1036_v18, %v1036_v18  ;;  %v1739_v41 = vcombine.low %v5616_v22, %v1053_v35 }
  0x67   : > { %v1737_v28 = vcombine.low %v1729_v11, %v1736_v16  ;;  %v732_v32 = vrot.slane %v718_v36, %v6689_v23  ;;  %v742_v42 = vrot.slane %v345_v13, %v6689_v23  ;;  %v1046_v43 = vcombine.high %v368_v8, %v368_v8  ;;  %v5617_v8 = vld.sshfl [vmem:[%s6640_s16 + $0x178] sm:$0x3 pattern:$0x76325410] }
  0x68   : > { %5982 = vmatmul.mubr.msk.f32.gmra.mrb[28].mxu0 %vm1865_vm2, %v1431_v38  ;;  %v1440_v44 = vrot.slane %v1432_v39, %v6689_v23  ;;  %v1738_v45 = vcombine.low %v1036_v18, %v1038_v40  ;;  %v1753_v46 = vrot.slane %v1739_v41, %v6689_v23  ;;  %v1061_v47 = vcombine.high %v1053_v35, %v1053_v35  ;;  %v372_v40 = vld [vmem:[%s6640_s16 + $0x188] sm:$0xff] }
  0x69   : > { %6036 = vmatmul.mubr.msk.f32.gmra.mrb[22].mxu1 %vm1865_vm2, %v1737_v28  ;;  %5984 = vmatprep.mubr.msk.f32.mxu0 %vm6511_vm1, %v6510_v2  ;;  %v734_v48 = vcombine.high %v732_v32, %v732_v32  ;;  %v1449_v24 = vcombine.low %v733_v37, %v732_v32  ;;  %v1060_v49 = vrot.slane %v1046_v43, %v6689_v23 }
  0x6a   : > { %v1448_v50 = vcombine.low %v1440_v44, %v1447_v19  ;;  %6038 = vmatprep.mubr.msk.f32.mxu1 %vm6511_vm1, %v6510_v2  ;;  %v1746_v51 = vrot.slane %v1738_v45, %v6689_v23  ;;  %v1070_v52 = vrot.slane %v369_v15, %v6689_v23  ;;  %v735_v53 = vcombine.high %v345_v13, %v345_v13 }
  0x6b   : > { %v1450_v54 = vcombine.low %v734_v48, %v742_v42  ;;  %v1457_v29 = vrot.slane %v1449_v24, %v6689_v23  ;;  %v1062_v33 = vcombine.high %v1060_v49, %v1060_v49  ;;  %v1755_v55 = vcombine.low %v1061_v47, %v1060_v49  ;;  %v374_v49 = vld [vmem:[%s6640_s16 + $0x198] sm:$0xff] }
  0x6c   : > { %5985 = vmatmul.mubr.msk.f32.gmra.mrb[30].mxu0 %vm1865_vm2, %v1448_v50  ;;  %v1754_v57 = vcombine.low %v1746_v51, %v1753_v46  ;;  %v749_v58 = vrot.slane %v735_v53, %v6689_v23  ;;  %v750_v20 = vcombine.high %v742_v42, %v742_v42  ;;  %v1063_v26 = vcombine.high %v369_v15, %v369_v15 }
  0x6d   : > { %5987 = vmatprep.mubr.msk.f32.mxu0 %vm6511_vm1, %v6510_v2  ;;  %v1464_v60 = vrot.slane %v1450_v54, %v6689_v23  ;;  %v1756_v61 = vcombine.low %v1062_v33, %v1070_v52  ;;  %v1763_v21 = vrot.slane %v1755_v55, %v6689_v23  ;;  %v1078_v62 = vcombine.high %v1070_v52, %v1070_v52  ;;  %v5610_v55 = vld.sshfl [vmem:[%s6640_s16 + $0xd0] sm:$0x3 pattern:$0x76325410] }
  0x6e   : > { %6039 = vmatmul.mubr.msk.f32.gmra.mrb[24].mxu1 %vm1865_vm2, %v1754_v57  ;;  %v751_v63 = vcombine.high %v749_v58, %v749_v58  ;;  %v1466_v0 = vcombine.low %v750_v20, %v749_v58  ;;  %v1077_v1 = vrot.slane %v1063_v26, %v6689_v23  ;;  %v759_v4 = vcombine.high %v347_v56, %v347_v56 }
  0x6f   : > { %v1465_v5 = vcombine.low %v1457_v29, %v1464_v60  ;;  %6041 = vmatprep.mubr.msk.f32.mxu1 %vm6511_vm1, %v6510_v2  ;;  %v1770_v6 = vrot.slane %v1756_v61, %v6689_v23  ;;  %v766_v9 = vrot.slane %v347_v56, %v6689_v23  ;;  %v1087_v12 = vcombine.high %v371_v59, %v371_v59 }
  0x70   : > { %v1467_v14 = vcombine.low %v751_v63, %v5609_v27  ;;  %v1474_v25 = vrot.slane %v1466_v0, %v6689_v23  ;;  %v1079_v30 = vcombine.high %v1077_v1, %v1077_v1  ;;  %v1772_v16 = vcombine.low %v1078_v62, %v1077_v1 }
  0x71   : > { %5988 = vmatmul.mubr.msk.f32.gmra.mrb[32].mxu0 %vm1865_vm2, %v1465_v5  ;;  %v1771_v22 = vcombine.low %v1763_v21, %v1770_v6  ;;  %v773_v31 = vrot.slane %v759_v4, %v6689_v23  ;;  %v774_v34 = vcombine.high %v766_v9, %v766_v9  ;;  %v1094_v18 = vrot.slane %v371_v59, %v6689_v23  ;;  %v375_v6 = vld [vmem:[%s6640_s16 + $0x1a0] sm:$0xff] }
  0x72   : > { %5990 = vmatprep.mubr.msk.f32.mxu0 %vm6511_vm1, %v6510_v2  ;;  %v1481_v35 = vrot.slane %v1467_v14, %v6689_v23  ;;  %v1773_v13 = vcombine.low %v1079_v30, %v5617_v8  ;;  %v1780_v11 = vrot.slane %v1772_v16, %v6689_v23  ;;  %v1101_v19 = vrot.slane %v1087_v12, %v6689_v23 }
  0x73   : > { %6042 = vmatmul.mubr.msk.f32.gmra.mrb[26].mxu1 %vm1865_vm2, %v1771_v22  ;;  %v775_v36 = vcombine.high %v773_v31, %v773_v31  ;;  %v1483_v37 = vcombine.low %v766_v9, %v774_v34  ;;  %v1102_v38 = vcombine.high %v1094_v18, %v1094_v18  ;;  %v776_v39 = vcombine.high %v348_v17, %v348_v17 }
  0x74   : > { %v1482_v41 = vcombine.low %v1474_v25, %v1481_v35  ;;  %6044 = vmatprep.mubr.msk.f32.mxu1 %vm6511_vm1, %v6510_v2  ;;  %v1787_v28 = vrot.slane %v1773_v13, %v6689_v23  ;;  %v1103_v32 = vcombine.high %v1101_v19, %v1101_v19  ;;  %v783_v42 = vrot.slane %v348_v17, %v6689_v23 }
  0x75   : > { %v1484_v15 = vcombine.low %v773_v31, %v775_v36  ;;  %v1491_v43 = vrot.slane %v1483_v37, %v6689_v23  ;;  %v1789_v44 = vcombine.low %v1094_v18, %v1102_v38  ;;  %v790_v45 = vrot.slane %v776_v39, %v6689_v23 }
  0x76   : > { %5991 = vmatmul.mubr.msk.f32.gmra.mrb[34].mxu0 %vm1865_vm2, %v1482_v41  ;;  %v1788_v46 = vcombine.low %v1780_v11, %v1787_v28  ;;  %v1790_v47 = vcombine.low %v1101_v19, %v1103_v32  ;;  %v791_v48 = vcombine.high %v783_v42, %v783_v42  ;;  %v1104_v24 = vcombine.high %v372_v40, %v372_v40 }
  0x77   : > { %5993 = vmatprep.mubr.msk.f32.mxu0 %vm6511_vm1, %v6510_v2  ;;  %v1498_v50 = vrot.slane %v1484_v15, %v6689_v23  ;;  %v1797_v51 = vrot.slane %v1789_v44, %v6689_v23  ;;  %v792_v52 = vcombine.high %v790_v45, %v790_v45  ;;  %v1111_v53 = vrot.slane %v372_v40, %v6689_v23  ;;  %v5619_v40 = vld.sshfl [vmem:[%s6640_s16 + $0x1a8] sm:$0x3 pattern:$0x76325410] }
  0x78   : > { %6045 = vmatmul.mubr.msk.f32.gmra.mrb[28].mxu1 %vm1865_vm2, %v1788_v46  ;;  %v1804_v54 = vrot.slane %v1790_v47, %v6689_v23  ;;  %v1500_v29 = vcombine.low %v783_v42, %v791_v48  ;;  %v1118_v33 = vrot.slane %v1104_v24, %v6689_v23  ;;  %v807_v56 = vrot.slane %v6668_v10, %v6689_v23  ;;  %v5618_v10 = vld.sshfl [vmem:[%s6640_s16 + $0x190] sm:$0x3 pattern:$0x76325410]  ;;  %v7065_v47 = vld [vmem:[%s7892_s2] ss:$0 sm:$0xff] }
  0x79   : > { %v1499_v57 = vcombine.low %v1491_v43, %v1498_v50  ;;  %6047 = vmatprep.mubr.msk.f32.mxu1 %vm6511_vm1, %v6510_v2  ;;  %v1501_v58 = vcombine.low %v790_v45, %v792_v52  ;;  %v1119_v20 = vcombine.high %v1111_v53, %v1111_v53  ;;  %v1128_v26 = vcombine.high %v374_v49, %v374_v49 }
  0x7a   : > { %v1805_v59 = vcombine.low %v1797_v51, %v1804_v54  ;;  %v1508_v60 = vrot.slane %v1500_v29, %v6689_v23  ;;  %v1120_v61 = vcombine.high %v1118_v33, %v1118_v33  ;;  %v815_v21 = vcombine.high %v807_v56, %v807_v56 }
  0x7b   : > { %5994 = vmatmul.mubr.msk.f32.gmra.mrb[36].mxu0 %vm1865_vm2, %v1499_v57  ;;  %v1515_v27 = vrot.slane %v1501_v58, %v6689_v23  ;;  %v1806_v62 = vcombine.low %v1111_v53, %v1119_v20  ;;  %v1517_v63 = vcombine.low %v5610_v55, %v807_v56  ;;  %v1135_v0 = vrot.slane %v374_v49, %v6689_v23 }
  0x7c   : > { %6048 = vmatmul.mubr.msk.f32.gmra.mrb[30].mxu1 %vm1865_vm2, %v1805_v59  ;;  %5996 = vmatprep.mubr.msk.f32.mxu0 %vm6511_vm1, %v6510_v2  ;;  %v1807_v1 = vcombine.low %v1118_v33, %v1120_v61  ;;  %v1518_v4 = vcombine.low %v815_v21, %v6732_v3  ;;  %v1142_v5 = vrot.slane %v1128_v26, %v6689_v23  ;;  %v7070_v29 = vadd.s32 16, %v6654_v7 }
  0x7d   : > { %v1516_v8 = vcombine.low %v1508_v60, %v1515_v27  ;;  %6050 = vmatprep.mubr.msk.f32.mxu1 %vm6511_vm1, %v6510_v2  ;;  %v1814_v9 = vrot.slane %v1806_v62, %v6689_v23  ;;  %v1525_v12 = vrot.slane %v1517_v63, %v6689_v23  ;;  %v1143_v14 = vcombine.high %v1135_v0, %v1135_v0 }
  0x7e   : > { %v1821_v25 = vrot.slane %v1807_v1, %v6689_v23  ;;  %v1532_v30 = vrot.slane %v1518_v4, %v6689_v23  ;;  %v1823_v16 = vcombine.low %v5618_v10, %v1135_v0  ;;  %v1144_v17 = vcombine.high %v1142_v5, %v1142_v5 }
  0x7f   : > { %5997 = vmatmul.mubr.msk.f32.gmra.mrb[38].mxu0 %vm1865_vm2, %v1516_v8  ;;  %v1824_v3 = vcombine.low %v1143_v14, %v1142_v5  ;;  %v1145_v22 = vcombine.high %v375_v6, %v375_v6  ;;  %v1152_v31 = vrot.slane %v375_v6, %v6689_v23  ;;  %vm3007_vm5 = vcmp.le.s32.totalorder %v7070_v29, 16 }
  0x80   : > { %v1822_v34 = vcombine.low %v1814_v9, %v1821_v25  ;;  %5999 = vmatprep.mubr.msk.f32.mxu0 %vm6511_vm1, %v6510_v2  ;;  %v1533_v18 = vcombine.low %v1525_v12, %v1532_v30  ;;  %v1831_v35 = vrot.slane %v1823_v16, %v6689_v23 }
  0x81   : > { %v1838_v13 = vrot.slane %v1824_v3, %v6689_v23  ;;  %v1159_v11 = vrot.slane %v1145_v22, %v6689_v23  ;;  %v1160_v19 = vcombine.high %v1152_v31, %v1152_v31  ;;  %v1840_v36 = vcombine.low %v1144_v17, %v1152_v31 }
  0x82   : > { %6051 = vmatmul.mubr.msk.f32.gmra.mrb[32].mxu1 %vm1865_vm2, %v1822_v34 }
  0x83   : > { %6000 = vmatmul.mubr.msk.f32.gmra.mrb[40].mxu0 %vm1865_vm2, %v1533_v18  ;;  %6053 = vmatprep.mubr.msk.f32.mxu1 %vm6511_vm1, %v6510_v2  ;;  %v1839_v37 = vcombine.low %v1831_v35, %v1838_v13  ;;  %v1841_v38 = vcombine.low %v1160_v19, %v1159_v11  ;;  %v1848_v39 = vrot.slane %v1840_v36, %v6689_v23 }
  0x84   : > { %v1161_v41 = vcombine.high %v1159_v11, %v1159_v11 }
  0x85   : > { %v1855_v28 = vrot.slane %v1841_v38, %v6689_v23 }
  0x86   : > { %6054 = vmatmul.mubr.msk.f32.gmra.mrb[34].mxu1 %vm1865_vm2, %v1839_v37  ;;  %v1857_v32 = vcombine.low %v1161_v41, %v5619_v40 }
  0x87   : > { %6056 = vmatprep.mubr.msk.f32.mxu1 %vm6511_vm1, %v6510_v2  ;;  %v1856_v42 = vcombine.low %v1848_v39, %v1855_v28 }
  0x88   : > { %v1864_v15 = vrot.slane %v1857_v32, %v6689_v23 }
  0x8a   : > { %6057 = vmatmul.mubr.msk.f32.gmra.mrb[36].mxu1 %vm1865_vm2, %v1856_v42 }
  0x8b   : > { %6059 = vmatprep.mubr.msk.f32.mxu1 %vm6511_vm1, %v6510_v2 }
  0x8e   : > { %6060 = vmatmul.mubr.msk.f32.gmra.mrb[38].mxu1 %vm1865_vm2, %v1864_v15 }
 0x100   : > { %v2018_v43 = vpop.f32.mrb[0].mxu0 }
 0x101   : > { %v5941_v44 = vpop.f32.mrb[1].mxu0 }
 0x104   : > { %v2023_v45 = vpop.f32.mrb[2].mxu0 }
 0x105   : > { %v5944_v46 = vpop.f32.mrb[3].mxu0 }
 0x108   : > { %v2028_v48 = vpop.f32.mrb[4].mxu0  ;;  %v2123_v24 = vpop.f32.mrb[0].mxu1 }
 0x109   : > { %v2029_v49 = vadd.f32 %v7065_v47, %v2028_v48  ;;  %v5947_v50 = vpop.f32.mrb[5].mxu0  ;;  %v2124_v51 = vadd.f32 %v7065_v47, %v2123_v24  ;;  %v6004_v52 = vpop.f32.mrb[1].mxu1 }
 0x10b   : > { %v2224_v53 = vmax.f32 %v2029_v49, 0.0  ;;  %v2243_v54 = vmax.f32 %v2124_v51, 0.0 }
 0x10c   : > { %v2033_v2 = vpop.f32.mrb[6].mxu0  ;;  %v2128_v33 = vpop.f32.mrb[2].mxu1 }
 0x10d   : > { %v2338_v55 = vcombine.high %v2224_v53, %v2224_v53  ;;  %v2345_v56 = vrot.slane %v2224_v53, %v6689_v23  ;;  %v2034_v57 = vadd.f32 %v7065_v47, %v2033_v2  ;;  %v5950_v58 = vpop.f32.mrb[7].mxu0  ;;  %v2661_v20 = vcombine.high %v2243_v54, %v2243_v54  ;;  %v6007_v26 = vpop.f32.mrb[3].mxu1 }
 0x10e   : > { %v7075_v59 = vrot.slane %v2243_v54, %v6689_v23  ;;  %v2129_v60 = vadd.f32 %v7065_v47, %v2128_v33 }
 0x10f   : > { %v2352_v61 = vrot.slane %v2338_v55, %v6689_v23  ;;  %v2353_v21 = vcombine.high %v2345_v56, %v2345_v56  ;;  %v2225_v27 = vmax.f32 %v2034_v57, 0.0  ;;  %v2675_v62 = vrot.slane %v2661_v20, %v6689_v23 }
 0x110   : > { %v2676_v63 = vcombine.high %v7075_v59, %v7075_v59  ;;  %v2038_v10 = vpop.f32.mrb[8].mxu0  ;;  %v2244_v0 = vmax.f32 %v2129_v60, 0.0  ;;  %v2133_v1 = vpop.f32.mrb[4].mxu1 }
 0x111   : > { %v3055_v4 = vcombine.low %v2353_v21, %v2352_v61  ;;  %v2354_v5 = vcombine.high %v2352_v61, %v2352_v61  ;;  %v2355_v6 = vcombine.high %v2225_v27, %v2225_v27  ;;  %v2362_v8 = vrot.slane %v2225_v27, %v6689_v23  ;;  %v5953_v9 = vpop.f32.mrb[9].mxu0  ;;  %v6010_v12 = vpop.f32.mrb[5].mxu1 }
 0x112   : > { %v3400_v14 = vcombine.low %v2676_v63, %v2675_v62  ;;  %v2039_v25 = vadd.f32 %v7065_v47, %v2038_v10  ;;  %v2677_v30 = vcombine.high %v2675_v62, %v2675_v62  ;;  %v2678_v16 = vcombine.high %v2244_v0, %v2244_v0 }
 0x113   : > { %v3063_v17 = vrot.slane %v3055_v4, %v6689_v23  ;;  %v2369_v3 = vrot.slane %v2355_v6, %v6689_v23  ;;  %v2370_v22 = vcombine.high %v2362_v8, %v2362_v8  ;;  %v3056_v31 = vcombine.low %v2354_v5, %v2362_v8 }
 0x114   : > { %v3408_v34 = vrot.slane %v3400_v14, %v6689_v23  ;;  %v2226_v18 = vmax.f32 %v2039_v25, 0.0  ;;  %v2685_v35 = vrot.slane %v2244_v0, %v6689_v23  ;;  %v2692_v13 = vrot.slane %v2678_v16, %v6689_v23  ;;  %v2043_v11 = vpop.f32.mrb[10].mxu0  ;;  %v2138_v19 = vpop.f32.mrb[6].mxu1 }
 0x115   : > { %v3070_v36 = vrot.slane %v3056_v31, %v6689_v23  ;;  %v3072_v37 = vcombine.low %v2370_v22, %v2369_v3  ;;  %v2371_v38 = vcombine.high %v2369_v3, %v2369_v3  ;;  %v2044_v39 = vadd.f32 %v7065_v47, %v2043_v11  ;;  %v5956_v40 = vpop.f32.mrb[11].mxu0  ;;  %v6013_v41 = vpop.f32.mrb[7].mxu1 }
 0x116   : > { %v2372_v28 = vcombine.high %v2226_v18, %v2226_v18  ;;  %v2379_v32 = vrot.slane %v2226_v18, %v6689_v23  ;;  %v2693_v42 = vcombine.high %v2685_v35, %v2685_v35  ;;  %v2694_v15 = vcombine.high %v2692_v13, %v2692_v13 }
 0x117   : > { %v3071_v43 = vcombine.low %v3063_v17, %v3070_v36  ;;  %v3080_v44 = vrot.slane %v3072_v37, %v6689_v23  ;;  %v3401_v45 = vcombine.low %v2677_v30, %v2685_v35  ;;  %v2227_v46 = vmax.f32 %v2044_v39, 0.0 }
 0x118   : > { %v2386_v48 = vrot.slane %v2372_v28, %v6689_v23  ;;  %v2387_v24 = vcombine.high %v2379_v32, %v2379_v32  ;;  %v3073_v49 = vcombine.low %v2371_v38, %v2379_v32  ;;  %v3423_v50 = vrot.slane %v2693_v42, %v6689_v23  ;;  %v2048_v51 = vpop.f32.mrb[12].mxu0 }
 0x119   : > { %v3809_v52 = vsel %vm2996_vm4, %v3071_v43, 0.0  ;;  %v3415_v53 = vrot.slane %v3401_v45, %v6689_v23  ;;  %v7100_v54 = vcombine.low %v2692_v13, %v2694_v15  ;;  %v2389_v2 = vcombine.high %v2227_v46, %v2227_v46  ;;  %v5959_v33 = vpop.f32.mrb[13].mxu0  ;;  %v2143_v55 = vpop.f32.mrb[8].mxu1 }
 0x11a   : > { %3864 = vst.msk [vmem:[#allocation2 + $0x18] sm:$0xff] %vm1865_vm2, %v3809_v52  ;;  %v2388_v56 = vcombine.high %v2386_v48, %v2386_v48  ;;  %v3087_v57 = vrot.slane %v3073_v49, %v6689_v23  ;;  %v3095_v58 = vrot.slane %v2387_v24, %v6689_v23  ;;  %v3835_v20 = vsel %vm3007_vm5, %v3423_v50, 0.0  ;;  %v6016_v26 = vpop.f32.mrb[9].mxu1 }
 0x11b   : > { %v3416_v60 = vcombine.low %v3408_v34, %v3415_v53  ;;  %v3432_v61 = vrot.slane %v7100_v54, %v6689_v23  ;;  %3890 = vst.msk [vmem:[#allocation2 + $0xe8] sm:$0x3] %vm3862_vm3, %v3835_v20  ;;  %v2396_v21 = vrot.slane %v2227_v46, %v6689_v23  ;;  %v2403_v27 = vrot.slane %v2389_v2, %v6689_v23 }
 0x11c   : > { %v3088_v62 = vcombine.low %v3080_v44, %v3087_v57  ;;  %v3096_v63 = vcombine.low %v2386_v48, %v2388_v56  ;;  %v3811_v10 = vsel %vm3007_vm5, %v3095_v58, 0.0  ;;  %v2134_v0 = vadd.f32 %v7065_v47, %v2133_v1  ;;  %v2053_v4 = vpop.f32.mrb[14].mxu0 }
 0x11d   : > { %3866 = vst.msk [vmem:[#allocation2 + $0x28] sm:$0x3] %vm3862_vm3, %v3811_v10  ;;  %v2404_v5 = vcombine.high %v2396_v21, %v2396_v21  ;;  %v2405_v6 = vcombine.high %v2403_v27, %v2403_v27  ;;  %v2049_v8 = vadd.f32 %v7065_v47, %v2048_v51  ;;  %v2139_v9 = vadd.f32 %v7065_v47, %v2138_v19  ;;  %v5962_v12 = vpop.f32.mrb[15].mxu0 }
 0x11e   : > { %3889 = vst.msk [vmem:[#allocation2 + $0xe0] sm:$0xff] %vm1865_vm2, %v3416_v60  ;;  %v3104_v14 = vrot.slane %v3096_v63, %v6689_v23  ;;  %3865 = vst.msk [vmem:[#allocation2 + $0x20] sm:$0xff] %vm1865_vm2, %v3088_v62  ;;  %v2245_v25 = vmax.f32 %v2134_v0, 0.0  ;;  %v2054_v30 = vadd.f32 %v7065_v47, %v2053_v4  ;;  %v2144_v1 = vadd.f32 %v7065_v47, %v2143_v55 }
 0x11f   : > { %v3097_v16 = vcombine.low %v2396_v21, %v2404_v5  ;;  %v3113_v17 = vcombine.low %v2403_v27, %v2405_v6  ;;  %v2228_v3 = vmax.f32 %v2049_v8, 0.0  ;;  %v2246_v22 = vmax.f32 %v2139_v9, 0.0  ;;  %v7123_v31 = vpop.f32.mrb[10].mxu1 }
 0x120   : > { %v2695_v34 = vcombine.high %v2245_v25, %v2245_v25  ;;  %v2702_v18 = vrot.slane %v2245_v25, %v6689_v23  ;;  %v2229_v35 = vmax.f32 %v2054_v30, 0.0  ;;  %v7126_v13 = vmax.f32 %v2144_v1, 0.0  ;;  %v2058_v11 = vpop.f32.mrb[16].mxu0  ;;  %v6019_v19 = vpop.f32.mrb[11].mxu1 }
 0x121   : > { %v3111_v36 = vrot.slane %v3097_v16, %v6689_v23  ;;  %v3121_v37 = vrot.slane %v3113_v17, %v6689_v23  ;;  %v2406_v38 = vcombine.high %v2228_v3, %v2228_v3  ;;  %v2413_v39 = vrot.slane %v2228_v3, %v6689_v23  ;;  %v5965_v40 = vpop.f32.mrb[17].mxu0 }
 0x122   : > { %v2709_v41 = vrot.slane %v2695_v34, %v6689_v23  ;;  %v2710_v28 = vcombine.high %v2702_v18, %v2702_v18  ;;  %v2712_v32 = vcombine.high %v2246_v22, %v2246_v22  ;;  %v2719_v42 = vrot.slane %v2246_v22, %v6689_v23 }
 0x123   : > { %v3112_v15 = vcombine.low %v3104_v14, %v3111_v36  ;;  %v2420_v43 = vrot.slane %v2406_v38, %v6689_v23  ;;  %v2421_v44 = vcombine.high %v2413_v39, %v2413_v39  ;;  %v2423_v45 = vcombine.high %v2229_v35, %v2229_v35  ;;  %v2153_v46 = vpop.f32.mrb[12].mxu1 }
 0x124   : > { %v2711_v48 = vcombine.high %v2709_v41, %v2709_v41  ;;  %v3425_v24 = vcombine.low %v2702_v18, %v2710_v28  ;;  %v2726_v49 = vrot.slane %v2712_v32, %v6689_v23  ;;  %v2727_v50 = vcombine.high %v2719_v42, %v2719_v42  ;;  %v2063_v51 = vpop.f32.mrb[18].mxu0  ;;  %v6022_v52 = vpop.f32.mrb[13].mxu1 }
 0x125   : > { %v3812_v53 = vsel %vm2996_vm4, %v3112_v15, 0.0  ;;  %v3114_v2 = vcombine.low %v2413_v39, %v2421_v44  ;;  %v3136_v33 = vrot.slane %v2420_v43, %v6689_v23  ;;  %v2422_v55 = vcombine.high %v2420_v43, %v2420_v43  ;;  %v5968_v56 = vpop.f32.mrb[19].mxu0 }
 0x126   : > { %3867 = vst.msk [vmem:[#allocation2 + $0x30] sm:$0xff] %vm1865_vm2, %v3812_v53  ;;  %v3439_v57 = vrot.slane %v3425_v24, %v6689_v23  ;;  %v3441_v58 = vcombine.low %v2709_v41, %v2711_v48  ;;  %v3442_v20 = vcombine.low %v2719_v42, %v2727_v50  ;;  %v3464_v26 = vrot.slane %v2726_v49, %v6689_v23 }
 0x127   : > { %v3128_v60 = vrot.slane %v3114_v2, %v6689_v23  ;;  %v3814_v21 = vsel %vm3007_vm5, %v3136_v33, 0.0  ;;  %v2430_v27 = vrot.slane %v2229_v35, %v6689_v23  ;;  %v2437_v62 = vrot.slane %v2423_v45, %v6689_v23 }
 0x128   : > { %v3440_v63 = vcombine.low %v3432_v61, %v3439_v57  ;;  %v3449_v10 = vrot.slane %v3441_v58, %v6689_v23  ;;  %3869 = vst.msk [vmem:[#allocation2 + $0x40] sm:$0x3] %vm3862_vm3, %v3814_v21  ;;  %v3456_v0 = vrot.slane %v3442_v20, %v6689_v23  ;;  %v3838_v4 = vsel %vm3007_vm5, %v3464_v26, 0.0  ;;  %v7154_v5 = vpop.f32.mrb[20].mxu0  ;;  %v7156_v6 = vpop.f32.mrb[14].mxu1 }
 0x129   : > { %v3129_v8 = vcombine.low %v3121_v37, %v3128_v60  ;;  %3893 = vst.msk [vmem:[#allocation2 + $0x100] sm:$0x3] %vm3862_vm3, %v3838_v4  ;;  %v2438_v9 = vcombine.high %v2430_v27, %v2430_v27  ;;  %v3137_v12 = vcombine.low %v2422_v55, %v2430_v27  ;;  %v2728_v54 = vcombine.high %v2726_v49, %v2726_v49  ;;  %v5971_v61 = vpop.f32.mrb[21].mxu0  ;;  %v6025_v14 = vpop.f32.mrb[15].mxu1 }
 0x12a   : > { %v3836_v25 = vsel %vm2996_vm4, %v3440_v63, 0.0  ;;  %v3457_v30 = vcombine.low %v3449_v10, %v3456_v0  ;;  %v2729_v1 = vcombine.high %v7126_v13, %v7126_v13  ;;  %v2736_v16 = vrot.slane %v7126_v13, %v6689_v23 }
 0x12b   : > { %3891 = vst.msk [vmem:[#allocation2 + $0xf0] sm:$0xff] %vm1865_vm2, %v3836_v25  ;;  %3868 = vst.msk [vmem:[#allocation2 + $0x38] sm:$0xff] %vm1865_vm2, %v3129_v8  ;;  %v3138_v17 = vcombine.low %v2438_v9, %v2437_v62  ;;  %v3145_v3 = vrot.slane %v3137_v12, %v6689_v23  ;;  %v2059_v22 = vadd.f32 %v7065_v47, %v2058_v11 }
 0x12c   : > { %v2439_v34 = vcombine.high %v2437_v62, %v2437_v62  ;;  %3892 = vst.msk [vmem:[#allocation2 + $0xf8] sm:$0xff] %vm1865_vm2, %v3457_v30  ;;  %v2743_v18 = vrot.slane %v2729_v1, %v6689_v23  ;;  %v2744_v35 = vcombine.high %v2736_v16, %v2736_v16  ;;  %v3465_v19 = vcombine.low %v2728_v54, %v2736_v16  ;;  %v7173_v13 = vpop.f32.mrb[22].mxu0 }
 0x12d   : > { %v2149_v36 = vadd.f32 %v7065_v47, %v7123_v31  ;;  %v3152_v37 = vrot.slane %v3138_v17, %v6689_v23  ;;  %v2230_v38 = vmax.f32 %v2059_v22, 0.0  ;;  %v2064_v39 = vadd.f32 %v7065_v47, %v2063_v51  ;;  %v5974_v11 = vpop.f32.mrb[23].mxu0  ;;  %v7178_v41 = vpop.f32.mrb[16].mxu1 }
 0x12e   : > { %v2154_v40 = vadd.f32 %v7065_v47, %v2153_v46  ;;  %v3466_v28 = vcombine.low %v2744_v35, %v2743_v18  ;;  %v3473_v32 = vrot.slane %v3465_v19, %v6689_v23  ;;  %v2745_v15 = vcombine.high %v2743_v18, %v2743_v18  ;;  %v6028_v43 = vpop.f32.mrb[17].mxu1 }
 0x12f   : > { %v2248_v42 = vmax.f32 %v2149_v36, 0.0  ;;  %v3153_v44 = vcombine.low %v3145_v3, %v3152_v37  ;;  %v2440_v31 = vcombine.high %v2230_v38, %v2230_v38  ;;  %v2447_v45 = vrot.slane %v2230_v38, %v6689_v23 }
 0x130   : > { %v2231_v48 = vmax.f32 %v2064_v39, 0.0  ;;  %v3480_v24 = vrot.slane %v3466_v28, %v6689_v23  ;;  %v2249_v46 = vmax.f32 %v2154_v40, 0.0  ;;  %v7184_v51 = vpop.f32.mrb[24].mxu0  ;;  %v2069_v11 = vadd.f32 %v7065_v47, %v7154_v5 }
 0x131   : > { %v2746_v49 = vcombine.high %v2248_v42, %v2248_v42  ;;  %v2753_v50 = vrot.slane %v2248_v42, %v6689_v23  ;;  %v3815_v52 = vsel %vm2996_vm4, %v3153_v44, 0.0  ;;  %v2454_v53 = vrot.slane %v2440_v31, %v6689_v23  ;;  %v5977_v55 = vpop.f32.mrb[25].mxu0 }
 0x132   : > { %v2455_v2 = vcombine.high %v2447_v45, %v2447_v45  ;;  %v3154_v33 = vcombine.low %v2439_v34, %v2447_v45  ;;  %3870 = vst.msk [vmem:[#allocation2 + $0x48] sm:$0xff] %vm1865_vm2, %v3815_v52  ;;  %v3481_v56 = vcombine.low %v3473_v32, %v3480_v24  ;;  %v2457_v27 = vcombine.high %v2231_v48, %v2231_v48 }
 0x133   : > { %v2760_v57 = vrot.slane %v2746_v49, %v6689_v23  ;;  %v2761_v58 = vcombine.high %v2753_v50, %v2753_v50  ;;  %v3482_v20 = vcombine.low %v2745_v15, %v2753_v50  ;;  %v2456_v26 = vcombine.high %v2454_v53, %v2454_v53 }
 0x134   : > { %v3155_v60 = vcombine.low %v2455_v2, %v2454_v53  ;;  %v3162_v21 = vrot.slane %v3154_v33, %v6689_v23  ;;  %v3839_v62 = vsel %vm2996_vm4, %v3481_v56, 0.0  ;;  %v7195_v4 = vpop.f32.mrb[18].mxu1  ;;  %v2464_v12 = vrot.slane %v2231_v48, %v6689_v23 }
 0x135   : > { %v2762_v63 = vcombine.high %v2760_v57, %v2760_v57  ;;  %v3483_v10 = vcombine.low %v2761_v58, %v2760_v57  ;;  %v3490_v0 = vrot.slane %v3482_v20, %v6689_v23  ;;  %3894 = vst.msk [vmem:[#allocation2 + $0x108] sm:$0xff] %vm1865_vm2, %v3839_v62  ;;  %v3177_v9 = vrot.slane %v2456_v26, %v6689_v23  ;;  %v7202_v61 = vpop.f32.mrb[26].mxu0  ;;  %v6031_v14 = vpop.f32.mrb[19].mxu1 }
 0x136   : > { %v3169_v8 = vrot.slane %v3155_v60, %v6689_v23  ;;  %v2471_v54 = vrot.slane %v2457_v27, %v6689_v23  ;;  %v2763_v1 = vcombine.high %v2249_v46, %v2249_v46  ;;  %v2770_v16 = vrot.slane %v2249_v46, %v6689_v23  ;;  %v5980_v17 = vpop.f32.mrb[27].mxu0 }
 0x137   : > { %v3497_v25 = vrot.slane %v3483_v10, %v6689_v23  ;;  %v3505_v30 = vrot.slane %v2762_v63, %v6689_v23  ;;  %v3817_v22 = vsel %vm3007_vm5, %v3177_v9, 0.0  ;;  %v2472_v34 = vcombine.high %v2464_v12, %v2464_v12 }
 0x138   : > { %v3170_v3 = vcombine.low %v3162_v21, %v3169_v8  ;;  %v2473_v18 = vcombine.high %v2471_v54, %v2471_v54  ;;  %3872 = vst.msk [vmem:[#allocation2 + $0x58] sm:$0x3] %vm3862_vm3, %v3817_v22  ;;  %v2777_v36 = vrot.slane %v2763_v1, %v6689_v23  ;;  %v2778_v37 = vcombine.high %v2770_v16, %v2770_v16  ;;  %v7213_v38 = vpop.f32.mrb[20].mxu1 }
 0x139   : > { %v3498_v35 = vcombine.low %v3490_v0, %v3497_v25  ;;  %v3841_v19 = vsel %vm3007_vm5, %v3505_v30, 0.0  ;;  %v3178_v39 = vcombine.low %v2464_v12, %v2472_v34  ;;  %v2159_v28 = vadd.f32 %v7065_v47, %v7156_v6  ;;  %v6034_v32 = vpop.f32.mrb[21].mxu1 }
 0x13a   : > { %3871 = vst.msk [vmem:[#allocation2 + $0x50] sm:$0xff] %vm1865_vm2, %v3170_v3  ;;  %v3179_v40 = vcombine.low %v2471_v54, %v2473_v18  ;;  %v2779_v42 = vcombine.high %v2777_v36, %v2777_v36  ;;  %v3506_v15 = vcombine.low %v2770_v16, %v2778_v37  ;;  %v2074_v43 = vadd.f32 %v7065_v47, %v7173_v13 }
 0x13b   : > { %3896 = vst.msk [vmem:[#allocation2 + $0x118] sm:$0x3] %vm3862_vm3, %v3841_v19  ;;  %v2164_v44 = vadd.f32 %v7065_v47, %v7178_v41  ;;  %v3186_v31 = vrot.slane %v3178_v39, %v6689_v23  ;;  %v2232_v48 = vmax.f32 %v2069_v11, 0.0  ;;  %v2250_v5 = vmax.f32 %v2159_v28, 0.0  ;;  %v7228_v24 = vpop.f32.mrb[28].mxu0 }
 0x13c   : > { %3895 = vst.msk [vmem:[#allocation2 + $0x110] sm:$0xff] %vm1865_vm2, %v3498_v35  ;;  %v3193_v45 = vrot.slane %v3179_v40, %v6689_v23  ;;  %v3507_v6 = vcombine.low %v2777_v36, %v2779_v42  ;;  %v3514_v49 = vrot.slane %v3506_v15, %v6689_v23  ;;  %v2233_v50 = vmax.f32 %v2074_v43, 0.0  ;;  %v5983_v52 = vpop.f32.mrb[29].mxu0  ;;  %v7231_v53 = vpop.f32.mrb[22].mxu1 }
 0x13d   : > { %v2251_v46 = vmax.f32 %v2164_v44, 0.0  ;;  %v2474_v2 = vcombine.high %v2232_v48, %v2232_v48  ;;  %v2481_v41 = vrot.slane %v2232_v48, %v6689_v23  ;;  %v2780_v33 = vcombine.high %v2250_v5, %v2250_v5  ;;  %v6037_v55 = vpop.f32.mrb[23].mxu1 }
 0x13e   : > { %v3194_v13 = vcombine.low %v3186_v31, %v3193_v45  ;;  %v3521_v56 = vrot.slane %v3507_v6, %v6689_v23  ;;  %v2787_v57 = vrot.slane %v2250_v5, %v6689_v23  ;;  %v2491_v58 = vcombine.high %v2233_v50, %v2233_v50 }
 0x13f   : > { %v2498_v20 = vrot.slane %v2233_v50, %v6689_v23  ;;  %v2488_v60 = vrot.slane %v2474_v2, %v6689_v23  ;;  %v2489_v21 = vcombine.high %v2481_v41, %v2481_v41  ;;  %v2794_v27 = vrot.slane %v2780_v33, %v6689_v23  ;;  %v7241_v62 = vpop.f32.mrb[30].mxu0 }
 0x140   : > { %v3818_v26 = vsel %vm2996_vm4, %v3194_v13, 0.0  ;;  %v3522_v63 = vcombine.low %v3514_v49, %v3521_v56  ;;  %v2795_v10 = vcombine.high %v2787_v57, %v2787_v57  ;;  %v2505_v0 = vrot.slane %v2491_v58, %v6689_v23  ;;  %v5986_v9 = vpop.f32.mrb[31].mxu0 }
 0x141   : > { %3873 = vst.msk [vmem:[#allocation2 + $0x60] sm:$0xff] %vm1865_vm2, %v3818_v26  ;;  %v2506_v8 = vcombine.high %v2498_v20, %v2498_v20  ;;  %v2490_v12 = vcombine.high %v2488_v60, %v2488_v60  ;;  %v3195_v54 = vcombine.low %v2481_v41, %v2489_v21  ;;  %v2796_v14 = vcombine.high %v2794_v27, %v2794_v27  ;;  %v7246_v30 = vpop.f32.mrb[24].mxu1 }
 0x142   : > { %v3218_v25 = vrot.slane %v2498_v20, %v6689_v23  ;;  %v3842_v1 = vsel %vm2996_vm4, %v3522_v63, 0.0  ;;  %v3523_v16 = vcombine.low %v2787_v57, %v2795_v10  ;;  %v2797_v3 = vcombine.high %v2251_v46, %v2251_v46  ;;  %v6040_v22 = vpop.f32.mrb[25].mxu1 }
 0x143   : > { %v7250_v17 = vcombine.low %v2506_v8, %v2505_v0  ;;  %3897 = vst.msk [vmem:[#allocation2 + $0x120] sm:$0xff] %vm1865_vm2, %v3842_v1  ;;  %v3196_v34 = vcombine.low %v2488_v60, %v2490_v12  ;;  %v3203_v18 = vrot.slane %v3195_v54, %v6689_v23  ;;  %v3524_v35 = vcombine.low %v2794_v27, %v2796_v14 }
 0x144   : > { %v3820_v19 = vsel %vm3007_vm5, %v3218_v25, 0.0  ;;  %v3531_v36 = vrot.slane %v3523_v16, %v6689_v23  ;;  %v2804_v39 = vrot.slane %v2251_v46, %v6689_v23  ;;  %v2811_v40 = vrot.slane %v2797_v3, %v6689_v23  ;;  %v7262_v11 = vpop.f32.mrb[32].mxu0 }
 0x145   : > { %v3227_v37 = vrot.slane %v7250_v17, %v6689_v23  ;;  %3875 = vst.msk [vmem:[#allocation2 + $0x70] sm:$0x3] %vm3862_vm3, %v3820_v19  ;;  %v3210_v28 = vrot.slane %v3196_v34, %v6689_v23  ;;  %v3538_v32 = vrot.slane %v3524_v35, %v6689_v23  ;;  %v2079_v42 = vadd.f32 %v7065_v47, %v7184_v51  ;;  %v5989_v43 = vpop.f32.mrb[33].mxu0 }
 0x146   : > { %v2507_v15 = vcombine.high %v2505_v0, %v2505_v0  ;;  %v2812_v44 = vcombine.high %v2804_v39, %v2804_v39  ;;  %v3546_v31 = vrot.slane %v2804_v39, %v6689_v23  ;;  %v2169_v45 = vadd.f32 %v7065_v47, %v7195_v4  ;;  %v7271_v5 = vpop.f32.mrb[26].mxu1 }
 0x147   : > { %v2813_v48 = vcombine.high %v2811_v40, %v2811_v40  ;;  %v3211_v6 = vcombine.low %v3203_v18, %v3210_v28  ;;  %v3539_v49 = vcombine.low %v3531_v36, %v3538_v32  ;;  %v2234_v50 = vmax.f32 %v2079_v42, 0.0  ;;  %v6043_v52 = vpop.f32.mrb[27].mxu1 }
 0x148   : > { %v2084_v46 = vadd.f32 %v7065_v47, %v7202_v61  ;;  %v3547_v13 = vcombine.low %v2812_v44, %v2811_v40  ;;  %v3844_v51 = vsel %vm3007_vm5, %v3546_v31, 0.0  ;;  %v2252_v2 = vmax.f32 %v2169_v45, 0.0 }
 0x149   : > { %v2174_v41 = vadd.f32 %v7065_v47, %v7213_v38  ;;  %3874 = vst.msk [vmem:[#allocation2 + $0x68] sm:$0xff] %vm1865_vm2, %v3211_v6  ;;  %3898 = vst.msk [vmem:[#allocation2 + $0x128] sm:$0xff] %vm1865_vm2, %v3539_v49  ;;  %v2508_v4 = vcombine.high %v2234_v50, %v2234_v50  ;;  %v2515_v33 = vrot.slane %v2234_v50, %v6689_v23  ;;  %v7285_v56 = vpop.f32.mrb[34].mxu0 }
 0x14a   : > { %3899 = vst.msk [vmem:[#allocation2 + $0x130] sm:$0x3] %vm3862_vm3, %v3844_v51  ;;  %v2235_v55 = vmax.f32 %v2084_v46, 0.0  ;;  %v2089_v61 = vadd.f32 %v7065_v47, %v7228_v24  ;;  %v3555_v57 = vrot.slane %v3547_v13, %v6689_v23  ;;  %v2814_v58 = vcombine.high %v2252_v2, %v2252_v2  ;;  %v5992_v26 = vpop.f32.mrb[35].mxu0 }
 0x14b   : > { %v2821_v38 = vrot.slane %v2252_v2, %v6689_v23  ;;  %v2253_v20 = vmax.f32 %v2174_v41, 0.0  ;;  %v2522_v60 = vrot.slane %v2508_v4, %v6689_v23  ;;  %v2523_v21 = vcombine.high %v2515_v33, %v2515_v33  ;;  %v7290_v10 = vpop.f32.mrb[28].mxu1 }
 0x14c   : > { %v3220_v27 = vcombine.low %v2507_v15, %v2515_v33  ;;  %v2525_v63 = vcombine.high %v2235_v55, %v2235_v55  ;;  %v2828_v0 = vrot.slane %v2814_v58, %v6689_v23  ;;  %v2532_v9 = vrot.slane %v2235_v55, %v6689_v23  ;;  %v6046_v12 = vpop.f32.mrb[29].mxu1 }
 0x14d   : > { %v2829_v8 = vcombine.high %v2821_v38, %v2821_v38  ;;  %v3548_v24 = vcombine.low %v2813_v48, %v2821_v38  ;;  %v3236_v14 = vcombine.low %v2523_v21, %v2522_v60  ;;  %v2524_v25 = vcombine.high %v2522_v60, %v2522_v60 }
 0x14e   : > { %v3234_v54 = vrot.slane %v3220_v27, %v6689_v23  ;;  %v2539_v1 = vrot.slane %v2525_v63, %v6689_v23  ;;  %v2540_v3 = vcombine.high %v2532_v9, %v2532_v9  ;;  %v2830_v22 = vcombine.high %v2828_v0, %v2828_v0  ;;  %v7297_v34 = vpop.f32.mrb[36].mxu0 }
 0x14f   : > { %v3562_v16 = vrot.slane %v3548_v24, %v6689_v23  ;;  %v3564_v17 = vcombine.low %v2829_v8, %v2828_v0  ;;  %v3244_v35 = vrot.slane %v3236_v14, %v6689_v23  ;;  %v3237_v36 = vcombine.low %v2524_v25, %v2532_v9  ;;  %v5995_v39 = vpop.f32.mrb[37].mxu0  ;;  %v7300_v40 = vpop.f32.mrb[30].mxu1 }
 0x150   : > { %v3235_v18 = vcombine.low %v3227_v37, %v3234_v54  ;;  %v2541_v19 = vcombine.high %v2539_v1, %v2539_v1  ;;  %v3259_v42 = vrot.slane %v2540_v3, %v6689_v23  ;;  %v2831_v15 = vcombine.high %v2253_v20, %v2253_v20  ;;  %v6049_v43 = vpop.f32.mrb[31].mxu1 }
 0x151   : > { %v3563_v28 = vcombine.low %v3555_v57, %v3562_v16  ;;  %v3572_v32 = vrot.slane %v3564_v17, %v6689_v23  ;;  %v3251_v31 = vrot.slane %v3237_v36, %v6689_v23  ;;  %v2838_v45 = vrot.slane %v2253_v20, %v6689_v23 }
 0x152   : > { %v3821_v44 = vsel %vm2996_vm4, %v3235_v18, 0.0  ;;  %v3260_v37 = vcombine.low %v2539_v1, %v2541_v19  ;;  %v3823_v6 = vsel %vm3007_vm5, %v3259_v42, 0.0  ;;  %v2845_v49 = vrot.slane %v2831_v15, %v6689_v23  ;;  %v7314_v46 = vpop.f32.mrb[38].mxu0 }
 0x153   : > { %3876 = vst.msk [vmem:[#allocation2 + $0x78] sm:$0xff] %vm1865_vm2, %v3821_v44  ;;  %v3845_v48 = vsel %vm2996_vm4, %v3563_v28, 0.0  ;;  %v2236_v50 = vmax.f32 %v2089_v61, 0.0  ;;  %v3252_v52 = vcombine.low %v3244_v35, %v3251_v31  ;;  %v2846_v51 = vcombine.high %v2838_v45, %v2838_v45  ;;  %v5998_v41 = vpop.f32.mrb[39].mxu0 }
 0x154   : > { %3900 = vst.msk [vmem:[#allocation2 + $0x138] sm:$0xff] %vm1865_vm2, %v3845_v48  ;;  %v3268_v13 = vrot.slane %v3260_v37, %v6689_v23  ;;  %v3565_v2 = vcombine.low %v2830_v22, %v2838_v45  ;;  %v2847_v4 = vcombine.high %v2845_v49, %v2845_v49  ;;  %v2179_v57 = vadd.f32 %v7065_v47, %v7231_v53 }
 0x155   : > { %3878 = vst.msk [vmem:[#allocation2 + $0x88] sm:$0x3] %vm3862_vm3, %v3823_v6  ;;  %v2542_v33 = vcombine.high %v2236_v50, %v2236_v50  ;;  %v2549_v55 = vrot.slane %v2236_v50, %v6689_v23  ;;  %v3587_v58 = vrot.slane %v2846_v51, %v6689_v23  ;;  %v2094_v38 = vadd.f32 %v7065_v47, %v7241_v62  ;;  %v7329_v26 = vpop.f32.mrb[32].mxu1 }
 0x156   : > { %3877 = vst.msk [vmem:[#allocation2 + $0x80] sm:$0xff] %vm1865_vm2, %v3252_v52  ;;  %v3579_v61 = vrot.slane %v3565_v2, %v6689_v23  ;;  %v2184_v20 = vadd.f32 %v7065_v47, %v7246_v30  ;;  %v3588_v60 = vcombine.low %v2845_v49, %v2847_v4  ;;  %v2254_v63 = vmax.f32 %v2179_v57, 0.0  ;;  %v7332_v53 = vpop.f32.mrb[40].mxu0  ;;  %v6052_v0 = vpop.f32.mrb[33].mxu1 }
 0x157   : > { %v2556_v21 = vrot.slane %v2542_v33, %v6689_v23  ;;  %v2557_v27 = vcombine.high %v2549_v55, %v2549_v55  ;;  %v3847_v24 = vsel %vm3007_vm5, %v3587_v58, 0.0  ;;  %v2237_v9 = vmax.f32 %v2094_v38, 0.0  ;;  %v6001_v62 = vpop.f32.mrb[41].mxu0 }
 0x158   : > { %v3580_v8 = vcombine.low %v3572_v32, %v3579_v61  ;;  %v2255_v12 = vmax.f32 %v2184_v20, 0.0  ;;  %v3596_v54 = vrot.slane %v3588_v60, %v6689_v23  ;;  %3902 = vst.msk [vmem:[#allocation2 + $0x148] sm:$0x3] %vm3862_vm3, %v3847_v24  ;;  %v2848_v25 = vcombine.high %v2254_v63, %v2254_v63 }
 0x159   : > { %v2558_v30 = vcombine.high %v2556_v21, %v2556_v21  ;;  %v3261_v14 = vcombine.low %v2549_v55, %v2557_v27  ;;  %v2855_v1 = vrot.slane %v2254_v63, %v6689_v23  ;;  %v2559_v16 = vcombine.high %v2237_v9, %v2237_v9  ;;  %v7341_v22 = vpop.f32.mrb[34].mxu1 }
 0x15a   : > { %3901 = vst.msk [vmem:[#allocation2 + $0x140] sm:$0xff] %vm1865_vm2, %v3580_v8  ;;  %v2566_v17 = vrot.slane %v2237_v9, %v6689_v23  ;;  %v2865_v3 = vcombine.high %v2255_v12, %v2255_v12  ;;  %v2862_v19 = vrot.slane %v2848_v25, %v6689_v23  ;;  %v2872_v36 = vrot.slane %v2255_v12, %v6689_v23  ;;  %v6055_v39 = vpop.f32.mrb[35].mxu1 }
 0x15b   : > { %v3275_v18 = vrot.slane %v3261_v14, %v6689_v23  ;;  %v3277_v35 = vcombine.low %v2556_v21, %v2558_v30  ;;  %v2863_v28 = vcombine.high %v2855_v1, %v2855_v1  ;;  %v2573_v32 = vrot.slane %v2559_v16, %v6689_v23 }
 0x15c   : > { %v2574_v42 = vcombine.high %v2566_v17, %v2566_v17  ;;  %v2879_v15 = vrot.slane %v2865_v3, %v6689_v23  ;;  %v2864_v31 = vcombine.high %v2862_v19, %v2862_v19  ;;  %v2880_v37 = vcombine.high %v2872_v36, %v2872_v36 }
 0x15d   : > { %v3276_v43 = vcombine.low %v3268_v13, %v3275_v18  ;;  %v3285_v44 = vrot.slane %v3277_v35, %v6689_v23  ;;  %v3589_v45 = vcombine.low %v2855_v1, %v2863_v28  ;;  %v3300_v6 = vrot.slane %v2573_v32, %v6689_v23  ;;  %v2213_v50 = vpop.f32.mrb[36].mxu1 }
 0x15e   : > { %v3278_v48 = vcombine.low %v2566_v17, %v2574_v42  ;;  %v3628_v49 = vrot.slane %v2879_v15, %v6689_v23  ;;  %v3605_v51 = vcombine.low %v2862_v19, %v2864_v31  ;;  %v3606_v2 = vcombine.low %v2872_v36, %v2880_v37  ;;  %v6058_v13 = vpop.f32.mrb[37].mxu1 }
 0x15f   : > { %v3824_v52 = vsel %vm2996_vm4, %v3276_v43, 0.0  ;;  %v2099_v41 = vadd.f32 %v7065_v47, %v7262_v11  ;;  %v3603_v4 = vrot.slane %v3589_v45, %v6689_v23  ;;  %v3826_v55 = vsel %vm3007_vm5, %v3300_v6, 0.0 }
 0x160   : > { %3879 = vst.msk [vmem:[#allocation2 + $0x90] sm:$0xff] %vm1865_vm2, %v3824_v52  ;;  %v3292_v33 = vrot.slane %v3278_v48, %v6689_v23  ;;  %v3850_v57 = vsel %vm3007_vm5, %v3628_v49, 0.0  ;;  %v3613_v61 = vrot.slane %v3605_v51, %v6689_v23  ;;  %v3620_v58 = vrot.slane %v3606_v2, %v6689_v23 }
 0x161   : > { %3881 = vst.msk [vmem:[#allocation2 + $0xa0] sm:$0x3] %vm3862_vm3, %v3826_v55  ;;  %3905 = vst.msk [vmem:[#allocation2 + $0x160] sm:$0x3] %vm3862_vm3, %v3850_v57  ;;  %v2238_v11 = vmax.f32 %v2099_v41, 0.0  ;;  %v2575_v38 = vcombine.high %v2573_v32, %v2573_v32  ;;  %v3604_v20 = vcombine.low %v3596_v54, %v3603_v4  ;;  %v2189_v21 = vadd.f32 %v7065_v47, %v7271_v5  ;;  %v2218_v63 = vpop.f32.mrb[38].mxu1 }
 0x162   : > { %v3293_v60 = vcombine.low %v3285_v44, %v3292_v33  ;;  %v2881_v27 = vcombine.high %v2879_v15, %v2879_v15  ;;  %v3621_v0 = vcombine.low %v3613_v61, %v3620_v58  ;;  %v2104_v9 = vadd.f32 %v7065_v47, %v7285_v56  ;;  %v6061_v12 = vpop.f32.mrb[39].mxu1 }
 0x163   : > { %v2576_v8 = vcombine.high %v2238_v11, %v2238_v11  ;;  %v2583_v24 = vrot.slane %v2238_v11, %v6689_v23  ;;  %v3848_v62 = vsel %vm2996_vm4, %v3604_v20, 0.0  ;;  %v2256_v54 = vmax.f32 %v2189_v21, 0.0  ;;  %v6413_v12 = vld [vmem:[%s7892_s2] ss:$0 sm:$0xff] }
 0x164   : > { %3880 = vst.msk [vmem:[#allocation2 + $0x98] sm:$0xff] %vm1865_vm2, %v3293_v60  ;;  %v2194_v30 = vadd.f32 %v7065_v47, %v7290_v10  ;;  %v2109_v5 = vadd.f32 %v7065_v47, %v7297_v34  ;;  %3903 = vst.msk [vmem:[#allocation2 + $0x150] sm:$0xff] %vm1865_vm2, %v3848_v62  ;;  %v2239_v1 = vmax.f32 %v2104_v9, 0.0  ;;  %v2199_v62 = vadd.f32 %v6413_v12, %v7300_v40 }
 0x165   : > { %3904 = vst.msk [vmem:[#allocation2 + $0x158] sm:$0xff] %vm1865_vm2, %v3621_v0  ;;  %v2590_v14 = vrot.slane %v2576_v8, %v6689_v23  ;;  %v2591_v56 = vcombine.high %v2583_v24, %v2583_v24  ;;  %v3301_v25 = vcombine.low %v2575_v38, %v2583_v24  ;;  %v2882_v16 = vcombine.high %v2256_v54, %v2256_v54 }
 0x166   : > { %v2889_v17 = vrot.slane %v2256_v54, %v6689_v23  ;;  %v2257_v3 = vmax.f32 %v2194_v30, 0.0  ;;  %v2240_v18 = vmax.f32 %v2109_v5, 0.0  ;;  %v2593_v36 = vcombine.high %v2239_v1, %v2239_v1 }
 0x167   : > { %v3302_v35 = vcombine.low %v2591_v56, %v2590_v14  ;;  %v3309_v10 = vrot.slane %v3301_v25, %v6689_v23  ;;  %v2592_v19 = vcombine.high %v2590_v14, %v2590_v14  ;;  %v2896_v47 = vrot.slane %v2882_v16, %v6689_v23 }
 0x168   : > { %v2897_v34 = vcombine.high %v2889_v17, %v2889_v17  ;;  %v3629_v39 = vcombine.low %v2881_v27, %v2889_v17  ;;  %v2600_v28 = vrot.slane %v2239_v1, %v6689_v23  ;;  %v2607_v42 = vrot.slane %v2593_v36, %v6689_v23 }
 0x169   : > { %v3316_v32 = vrot.slane %v3302_v35, %v6689_v23  ;;  %v2899_v15 = vcombine.high %v2257_v3, %v2257_v3  ;;  %v2906_v43 = vrot.slane %v2257_v3, %v6689_v23  ;;  %v2898_v49 = vcombine.high %v2896_v47, %v2896_v47 }
 0x16a   : > { %v3630_v44 = vcombine.low %v2897_v34, %v2896_v47  ;;  %v3637_v31 = vrot.slane %v3629_v39, %v6689_v23  ;;  %v2608_v37 = vcombine.high %v2600_v28, %v2600_v28  ;;  %v3318_v45 = vcombine.low %v2592_v19, %v2600_v28 }
 0x16b   : > { %v3317_v48 = vcombine.low %v3309_v10, %v3316_v32  ;;  %v2609_v6 = vcombine.high %v2607_v42, %v2607_v42  ;;  %v2913_v50 = vrot.slane %v2899_v15, %v6689_v23  ;;  %v2914_v41 = vcombine.high %v2906_v43, %v2906_v43 }
 0x16c   : > { %v3644_v52 = vrot.slane %v3630_v44, %v6689_v23  ;;  %v3319_v51 = vcombine.low %v2608_v37, %v2607_v42  ;;  %v3326_v2 = vrot.slane %v3318_v45, %v6689_v23  ;;  %v3646_v55 = vcombine.low %v2898_v49, %v2906_v43 }
 0x16d   : > { %v3827_v13 = vsel %vm2996_vm4, %v3317_v48, 0.0  ;;  %v3341_v4 = vrot.slane %v2609_v6, %v6689_v23  ;;  %v2915_v33 = vcombine.high %v2913_v50, %v2913_v50  ;;  %v3647_v58 = vcombine.low %v2914_v41, %v2913_v50 }
 0x16e   : > { %3882 = vst.msk [vmem:[#allocation2 + $0xa8] sm:$0xff] %vm1865_vm2, %v3827_v13  ;;  %v3645_v57 = vcombine.low %v3637_v31, %v3644_v52  ;;  %v3333_v61 = vrot.slane %v3319_v51, %v6689_v23  ;;  %v2610_v11 = vcombine.high %v2240_v18, %v2240_v18  ;;  %v3654_v20 = vrot.slane %v3646_v55, %v6689_v23 }
 0x16f   : > { %v3829_v38 = vsel %vm3007_vm5, %v3341_v4, 0.0  ;;  %v3669_v60 = vrot.slane %v2915_v33, %v6689_v23  ;;  %v2617_v21 = vrot.slane %v2240_v18, %v6689_v23  ;;  %v3661_v0 = vrot.slane %v3647_v58, %v6689_v23 }
 0x170   : > { %v3851_v27 = vsel %vm2996_vm4, %v3645_v57, 0.0  ;;  %v3334_v63 = vcombine.low %v3326_v2, %v3333_v61  ;;  %3884 = vst.msk [vmem:[#allocation2 + $0xb8] sm:$0x3] %vm3862_vm3, %v3829_v38  ;;  %v2624_v8 = vrot.slane %v2610_v11, %v6689_v23  ;;  %v2114_v54 = vadd.f32 %v6413_v12, %v7314_v46 }
 0x171   : > { %3906 = vst.msk [vmem:[#allocation2 + $0x168] sm:$0xff] %vm1865_vm2, %v3851_v27  ;;  %v3853_v24 = vsel %vm3007_vm5, %v3669_v60, 0.0  ;;  %v2625_v9 = vcombine.high %v2617_v21, %v2617_v21  ;;  %v3662_v30 = vcombine.low %v3654_v20, %v3661_v0  ;;  %v2204_v14 = vadd.f32 %v6413_v12, %v7329_v26 }
 0x172   : > { %3883 = vst.msk [vmem:[#allocation2 + $0xb0] sm:$0xff] %vm1865_vm2, %v3334_v63  ;;  %v2626_v5 = vcombine.high %v2624_v8, %v2624_v8  ;;  %v2119_v56 = vadd.f32 %v6413_v12, %v7332_v53  ;;  %v2258_v1 = vmax.f32 %v2199_v62, 0.0  ;;  %v2241_v16 = vmax.f32 %v2114_v54, 0.0 }
 0x173   : > { %3908 = vst.msk [vmem:[#allocation2 + $0x178] sm:$0x3] %vm3862_vm3, %v3853_v24  ;;  %v3342_v25 = vcombine.low %v2617_v21, %v2625_v9  ;;  %v2259_v3 = vmax.f32 %v2204_v14, 0.0  ;;  %v2209_v46 = vadd.f32 %v6413_v12, %v7341_v22 }
 0x174   : > { %3907 = vst.msk [vmem:[#allocation2 + $0x170] sm:$0xff] %vm1865_vm2, %v3662_v30  ;;  %v3343_v17 = vcombine.low %v2624_v8, %v2626_v5  ;;  %v2242_v40 = vmax.f32 %v2119_v56, 0.0  ;;  %v2916_v35 = vcombine.high %v2258_v1, %v2258_v1  ;;  %v2923_v10 = vrot.slane %v2258_v1, %v6689_v23 }
 0x175   : > { %v3350_v18 = vrot.slane %v3342_v25, %v6689_v23  ;;  %v2627_v19 = vcombine.high %v2241_v16, %v2241_v16  ;;  %v2634_v53 = vrot.slane %v2241_v16, %v6689_v23  ;;  %v2933_v36 = vcombine.high %v2259_v3, %v2259_v3 }
 0x176   : > { %v3357_v26 = vrot.slane %v3343_v17, %v6689_v23  ;;  %v2940_v47 = vrot.slane %v2259_v3, %v6689_v23  ;;  %v2930_v34 = vrot.slane %v2916_v35, %v6689_v23  ;;  %v2931_v39 = vcombine.high %v2923_v10, %v2923_v10 }
 0x177   : > { %v2641_v28 = vrot.slane %v2627_v19, %v6689_v23  ;;  %v2644_v32 = vcombine.high %v2242_v40, %v2242_v40  ;;  %v2642_v42 = vcombine.high %v2634_v53, %v2634_v53  ;;  %v2947_v15 = vrot.slane %v2933_v36, %v6689_v23 }
 0x178   : > { %v3358_v22 = vcombine.low %v3350_v18, %v3357_v26  ;;  %v2948_v43 = vcombine.high %v2940_v47, %v2940_v47  ;;  %v2932_v44 = vcombine.high %v2930_v34, %v2930_v34  ;;  %v3670_v31 = vcombine.low %v2923_v10, %v2931_v39 }
 0x179   : > { %v2643_v37 = vcombine.high %v2641_v28, %v2641_v28  ;;  %v2651_v45 = vrot.slane %v2242_v40, %v6689_v23  ;;  %v3359_v6 = vcombine.low %v2634_v53, %v2642_v42  ;;  %v2949_v49 = vcombine.high %v2947_v15, %v2947_v15 }
 0x17a   : > { %v3830_v48 = vsel %vm2996_vm4, %v3358_v22, 0.0  ;;  %v3687_v50 = vcombine.low %v2940_v47, %v2948_v43  ;;  %v3671_v52 = vcombine.low %v2930_v34, %v2932_v44  ;;  %v3678_v51 = vrot.slane %v3670_v31, %v6689_v23 }
 0x17b   : > { %3885 = vst.msk [vmem:[#allocation2 + $0xc0] sm:$0xff] %vm1865_vm2, %v3830_v48  ;;  %v3360_v2 = vcombine.low %v2641_v28, %v2643_v37  ;;  %v2658_v41 = vrot.slane %v2644_v32, %v6689_v23  ;;  %v3367_v13 = vrot.slane %v3359_v6, %v6689_v23  ;;  %v3688_v4 = vcombine.low %v2947_v15, %v2949_v49 }
 0x17c   : > { %v3695_v33 = vrot.slane %v3687_v50, %v6689_v23  ;;  %v2659_v55 = vcombine.high %v2651_v45, %v2651_v45  ;;  %v3685_v57 = vrot.slane %v3671_v52, %v6689_v23  ;;  %v3382_v11 = vrot.slane %v2651_v45, %v6689_v23 }
 0x17d   : > { %v3374_v61 = vrot.slane %v3360_v2, %v6689_v23  ;;  %v2660_v58 = vcombine.high %v2658_v41, %v2658_v41  ;;  %v3702_v38 = vrot.slane %v3688_v4, %v6689_v23  ;;  %v2260_v60 = vmax.f32 %v2209_v46, 0.0 }
 0x17e   : > { %v3383_v20 = vcombine.low %v2659_v55, %v2658_v41  ;;  %v3686_v21 = vcombine.low %v3678_v51, %v3685_v57  ;;  %v3832_v0 = vsel %vm3007_vm5, %v3382_v11, 0.0 }
 0x17f   : > { %v3375_v27 = vcombine.low %v3367_v13, %v3374_v61  ;;  %v3384_v63 = vcombine.low %v2660_v58, %v7075_v59  ;;  %v3703_v8 = vcombine.low %v3695_v33, %v3702_v38  ;;  %3887 = vst.msk [vmem:[#allocation2 + $0xd0] sm:$0x3] %vm3862_vm3, %v3832_v0  ;;  %v2957_v24 = vrot.slane %v2260_v60, %v6689_v23 }
 0x180   : > { %v3854_v9 = vsel %vm2996_vm4, %v3686_v21, 0.0  ;;  %v3391_v12 = vrot.slane %v3383_v20, %v6689_v23 }
 0x181   : > { %3886 = vst.msk [vmem:[#allocation2 + $0xc8] sm:$0xff] %vm1865_vm2, %v3375_v27  ;;  %v3398_v62 = vrot.slane %v3384_v63, %v6689_v23  ;;  %3909 = vst.msk [vmem:[#allocation2 + $0x180] sm:$0xff] %vm1865_vm2, %v3854_v9  ;;  %v3710_v59 = vrot.slane %v2957_v24, %v6689_v23 }
 0x182   : > { %3910 = vst.msk [vmem:[#allocation2 + $0x188] sm:$0xff] %vm1865_vm2, %v3703_v8 }
 0x183   : > { %v3399_v54 = vcombine.low %v3391_v12, %v3398_v62  ;;  %v3856_v30 = vsel %vm3007_vm5, %v3710_v59, 0.0 }
 0x184   : > { %3911 = vst.msk [vmem:[#allocation2 + $0x190] sm:$0x3] %vm3862_vm3, %v3856_v30 }
 0x185   : > { %v3833_v5 = vsel %vm2996_vm4, %v3399_v54, 0.0 }
 0x186   : > { %3888 = vst.msk [vmem:[#allocation2 + $0xd8] sm:$0xff] %vm1865_vm2, %v3833_v5 }
 0x187 PF: > { %vm3989_vm6 = vcmask 1043456   ;;  %v7463_v14 = vld [vmem:[%s7893_s3 + $0xc] sm:$0xf]  ;;  %s5664_s20 = smul.u32 96, %s6492_s30  ;;  %vm3972_vm7 = vcmask 31744   ;;  %vm3949_vm8 = vcmask 1046528  }
 0x188   : > { %6104 = vmatprep.subr.msk.mxu0 %vm3989_vm6, %v7463_v14  ;;  %v5704_v7 = vld [vmem:[%s7893_s3 + $0x10] sm:$0xf]  ;;  %v5665_v23 = vld [vmem:[%s7893_s3 + $0x4] sm:$0xf]  ;;  %v3936_v29 = vld [vmem:[%s7893_s3] sm:$0xf] }
 0x189   : > { %6105 = vmatpush3.msk.msra.mxu0 %vm3989_vm6, %v7463_v14  ;;  %6062 = vmatprep.subr.msk.mxu1 %vm3989_vm6, %v5665_v23  ;;  %s7482_s14 = scalar_lea.vmem [#allocation2], %s5664_s20  ;;  %v5714_v46 = vld [vmem:[%s7893_s3 + $0x14] sm:$0xf]  ;;  %v5684_v31 = vld [vmem:[%s7893_s3 + $0x8] sm:$0xf]  ;;  %vm4222_vm9 = vcmask 1045504   ;;  %s7770_s25 = scalar_lea.vmem %s6640_s16, %s5664_s20 }
 0x18a   : > { %6118 = vmatprep.subr.msk.mxu0 %vm3989_vm6, %v5704_v7  ;;  %6063 = vmatpush3.msk.msra.mxu1 %vm3989_vm6, %v5665_v23  ;;  %v5724_v52 = vld [vmem:[%s7893_s3 + $0x18] sm:$0xf]  ;;  %v5734_v12 = vld [vmem:[%s7893_s3 + $0x1c] sm:$0xf]  ;;  %vm5486_vm10 = vcmask 130048   ;;  %s5791_s26 = sshll.u32 %s6496_s9, 5 }
 0x18b   : > { %6076 = vmatprep.subr.msk.mxu1 %vm3989_vm6, %v3936_v29  ;;  %s5512_s9 = sshll.u32 %s6642_s17, 4  ;;  %s6513_s20 = smov [#allocation3]   ;;  %s7830_s9 = int_to_ptr.vmem [resolvable:$true] %s5512_s9 }
 0x18c   : > { %s6414_s16 = scalar_lea.vmem %s7830_s9, 1024 }
 0x18d   : > { %v7485_v56 = vld [vmem:[%s7482_s14 + $0x18] sm:$0xff]  ;;  %v7489_v25 = vld [vmem:[%s7482_s14 + $0x20] sm:$0xff]  ;;  %v7500_v3 = vld [vmem:[%s7482_s14 + $0x8] sm:$0xff]  ;;  %p6415_p0 = scmp.ne.s32.totalorder %s7830_s9, %s6414_s16 }
 0x18e   : > { %v7493_v1 = vld [vmem:[%s7482_s14] sm:$0xff]  ;;  %v3955_v16 = vrot.slane %v7485_v56, 1  ;;  %6106 = vmatprep.mubr.msk.f32.mxu0 %vm3972_vm7, %v7485_v56  ;;  %v3956_v17 = vrot.slane %v7489_v25, 1  ;;  %v7503_v40 = vld [vmem:[%s7482_s14 + $0x30] sm:$0xff]  ;;  %v3951_v35 = vrot.slane %v7500_v3, 1  ;;  %v7521_v26 = vld [vmem:[%s7482_s14 + $0x38] sm:$0xff] }
 0x18f   : > { %6107 = vmatmul.mubr.msk.f32.vlgmr.msra.gmra.mrb[0].mxu0 %vm3972_vm7, %v7489_v25  ;;  %v3950_v18 = vrot.slane %v7493_v1, 1  ;;  %v7514_v10 = vld [vmem:[%s7482_s14 + $0x10] sm:$0x3]  ;;  %v7524_v53 = vld [vmem:[%s7482_s14 + $0x28] sm:$0x3]  ;;  %v3960_v36 = vrot.slane %v7503_v40, 1  ;;  %p6416_p1 = pnand %p6415_p0, %p6612_p3 }
 0x190   : > { %6119 = vmatpush3.msk.msra.mxu0 %vm3989_vm6, %v5704_v7  ;;  %v3953_v19 = vrot.slane %v7514_v10, 1  ;;  %6109 = vmatprep.mubr.msk.f32.mxu0 %vm3972_vm7, %v7503_v40  ;;  %v3957_v34 = vsel %vm3949_vm8, %v3955_v16, %v3956_v17  ;;  %v3958_v39 = vrot.slane %v7524_v53, 1  ;;  %v3961_v28 = vrot.slane %v7521_v26, 1  ;;  %v7533_v32 = vld [vmem:[%s7482_s14 + $0x40] sm:$0x3]  ;;  %v7538_v42 = vld [vmem:[%s7482_s14 + $0x48] sm:$0xff] }
 0x191   : > { %v3952_v47 = vsel %vm3949_vm8, %v3950_v18, %v3951_v35  ;;  %6132 = vmatprep.subr.msk.mxu0 %vm3989_vm6, %v5714_v46  ;;  %v7541_v15 = vld [vmem:[%s7482_s14 + $0x50] sm:$0xff]  ;;  %v3963_v44 = vrot.slane %v7533_v32, 1  ;;  %v3965_v45 = vrot.slane %v7538_v42, 1  ;;  %v7559_v6 = vld [vmem:[%s7482_s14 + $0x58] sm:$0x3]  ;;  %v7563_v49 = vld [vmem:[%s7482_s14 + $0x60] sm:$0xff]  ;;  %p6417_p2 = pneg %p6416_p1 }
 0x192   : > { %6064 = vmatprep.mubr.msk.f32.mxu1 %vm3972_vm7, %v3952_v47  ;;  %v3954_v22 = vsel %vm3949_vm8, %v3951_v35, %v3953_v19  ;;  %v3959_v43 = vsel %vm3949_vm8, %v3956_v17, %v3958_v39  ;;  %v7554_v37 = vsel %vm3949_vm8, %v3960_v36, %v3961_v28  ;;  %v3966_v48 = vrot.slane %v7541_v15, 1  ;;  %v7566_v50 = vld [vmem:[%s7482_s14 + $0x68] sm:$0xff]  ;;  %v3932_v33 = vld [vmem:[%s7482_s14 + $0x70] sm:$0x3] }
 0x193   : > { %6065 = vmatmul.mubr.msk.f32.vlgmr.msra.gmra.mrb[0].mxu1 %vm3972_vm7, %v3954_v22  ;;  %6110 = vmatmul.mubr.msk.f32.gmra.mrb[2].mxu0 %vm3972_vm7, %v7521_v26  ;;  %v7578_v51 = vsel %vm3949_vm8, %v3961_v28, %v3963_v44  ;;  %v3968_v2 = vrot.slane %v7559_v6, 1  ;;  %v4502_v13 = vrot.slane %v7563_v49, 1  ;;  %v4503_v4 = vrot.slane %v7566_v50, 1  ;;  %v5345_v22 = vld [vmem:[%s7897_s7] sm:$0xf] }
 0x194   : > { %6067 = vmatprep.mubr.msk.f32.mxu1 %vm3972_vm7, %v3957_v34  ;;  %6120 = vmatprep.mubr.msk.f32.mxu0 %vm3972_vm7, %v3957_v34  ;;  %v7584_v41 = vsel %vm3949_vm8, %v3965_v45, %v3966_v48  ;;  %v4505_v57 = vrot.slane %v3932_v33, 1  ;;  %v4228_v61 = vrot.slane %v7485_v56, 2  ;;  %v4229_v58 = vrot.slane %v7489_v25, 2 }
 0x195   : > { %6077 = vmatpush3.msk.msra.mxu1 %vm3989_vm6, %v3936_v29  ;;  %v7597_v55 = vsel %vm3949_vm8, %v3966_v48, %v3968_v2  ;;  %v7604_v11 = vsel %vm3949_vm8, %v4502_v13, %v4503_v4  ;;  %v4231_v38 = vrot.slane %v7524_v53, 2  ;;  %v4233_v21 = vrot.slane %v7503_v40, 2 }
 0x196   : > { %6090 = vmatprep.subr.msk.mxu1 %vm3989_vm6, %v5684_v31  ;;  %v7616_v20 = vsel %vm3949_vm8, %v4503_v4, %v4505_v57  ;;  %v4230_v60 = vsel %vm4222_vm9, %v4228_v61, %v4229_v58  ;;  %v4234_v27 = vrot.slane %v7521_v26, 2  ;;  %v4236_v0 = vrot.slane %v7533_v32, 2  ;;  %v5158_v32 = vld [vmem:[%s7895_s5] sm:$0xf] }
 0x197   : > { %6068 = vmatmul.mubr.msk.f32.gmra.mrb[2].mxu1 %vm3972_vm7, %v3959_v43  ;;  %6121 = vmatmul.mubr.msk.f32.vlgmr.msra.gmra.mrb[0].mxu0 %vm3972_vm7, %v3959_v43  ;;  %v4232_v63 = vsel %vm4222_vm9, %v4229_v58, %v4231_v38  ;;  %v4238_v8 = vrot.slane %v7538_v42, 2  ;;  %v4239_v24 = vrot.slane %v7541_v15, 2  ;;  %v4241_v59 = vrot.slane %v7559_v6, 2 }
 0x198   : > { %6133 = vmatpush3.msk.msra.mxu0 %vm3989_vm6, %v5714_v46  ;;  %6070 = vmatprep.mubr.msk.f32.mxu1 %vm3972_vm7, %v7554_v37  ;;  %v7634_v9 = vsel %vm4222_vm9, %v4233_v21, %v4234_v27  ;;  %v7648_v62 = vsel %vm4222_vm9, %v4234_v27, %v4236_v0  ;;  %v4223_v54 = vrot.slane %v7493_v1, 2  ;;  %v4224_v5 = vrot.slane %v7500_v3, 2  ;;  %v5744_v46 = vld [vmem:[%s7893_s3 + $0x20] sm:$0xf] }
 0x199   : > { %6123 = vmatprep.mubr.msk.f32.mxu0 %vm3972_vm7, %v7554_v37  ;;  %6146 = vmatprep.subr.msk.mxu0 %vm3989_vm6, %v5724_v52  ;;  %v7655_v30 = vsel %vm4222_vm9, %v4238_v8, %v4239_v24  ;;  %v4629_v7 = vrot.slane %v7563_v49, 2  ;;  %v4630_v23 = vrot.slane %v7566_v50, 2  ;;  %v4226_v29 = vrot.slane %v7514_v10, 2  ;;  %v3935_v10 = vld [vmem:[%s7482_s14 + $0x88] sm:$0x3] }
 0x19a   : > { %v4884_v19 = vrot.slane %v3935_v10, 1  ;;  %v5011_v34 = vrot.slane %v3935_v10, 2  ;;  %v5773_v10 = vld [vmem:[%s7770_s25 + $0x48] sm:$0xff] }
 0x19b   : > { %6071 = vmatmul.mubr.msk.f32.gmra.mrb[4].mxu1 %vm3972_vm7, %v7578_v51  ;;  %6124 = vmatmul.mubr.msk.f32.gmra.mrb[2].mxu0 %vm3972_vm7, %v7578_v51  ;;  %v4631_v16 = vsel %vm4222_vm9, %v4629_v7, %v4630_v23  ;;  %v4227_v17 = vsel %vm4222_vm9, %v4224_v5, %v4226_v29 }
 0x19c   : > { %6073 = vmatprep.mubr.msk.f32.mxu1 %vm3972_vm7, %v7584_v41  ;;  %6126 = vmatprep.mubr.msk.f32.mxu0 %vm3972_vm7, %v7584_v41 }
 0x19f   : > { %6074 = vmatmul.mubr.msk.f32.gmra.mrb[6].mxu1 %vm3972_vm7, %v7597_v55  ;;  %6127 = vmatmul.mubr.msk.f32.gmra.mrb[4].mxu0 %vm3972_vm7, %v7597_v55 }
 0x1a0   : > { %6078 = vmatprep.mubr.msk.f32.mxu1 %vm3972_vm7, %v7493_v1  ;;  %6129 = vmatprep.mubr.msk.f32.mxu0 %vm3972_vm7, %v7604_v11  ;;  %v4225_v1 = vsel %vm4222_vm9, %v4223_v54, %v4224_v5 }
 0x1a3   : > { %6079 = vmatmul.mubr.msk.f32.vlgmr.msra.gmra.mrb[0].mxu1 %vm3972_vm7, %v7500_v3  ;;  %6130 = vmatmul.mubr.msk.f32.gmra.mrb[6].mxu0 %vm3972_vm7, %v7616_v20 }
 0x1a4   : > { %6081 = vmatprep.mubr.msk.f32.mxu1 %vm3972_vm7, %v7485_v56  ;;  %6134 = vmatprep.mubr.msk.f32.mxu0 %vm3972_vm7, %v4230_v60  ;;  %v4242_v56 = vsel %vm4222_vm9, %v4239_v24, %v4241_v59 }
 0x1a5   : > { %6091 = vmatpush3.msk.msra.mxu1 %vm3989_vm6, %v5684_v31 }
 0x1a6   : > { %6218 = vmatprep.subr.msk.mxu1 %vm3989_vm6, %v7463_v14 }
 0x1a7   : > { %6082 = vmatmul.mubr.msk.f32.gmra.mrb[2].mxu1 %vm3972_vm7, %v7489_v25  ;;  %6135 = vmatmul.mubr.msk.f32.vlgmr.msra.gmra.mrb[0].mxu0 %vm3972_vm7, %v4232_v63  ;;  %v4632_v25 = vrot.slane %v3932_v33, 2 }
 0x1a8   : > { %6147 = vmatpush3.msk.msra.mxu0 %vm3989_vm6, %v5724_v52  ;;  %6084 = vmatprep.mubr.msk.f32.mxu1 %vm3972_vm7, %v7503_v40 }
 0x1a9   : > { %6137 = vmatprep.mubr.msk.f32.mxu0 %vm3972_vm7, %v7634_v9  ;;  %6160 = vmatprep.subr.msk.mxu0 %vm3989_vm6, %v5734_v12  ;;  %v4633_v3 = vsel %vm4222_vm9, %v4630_v23, %v4632_v25 }
 0x1ab   : > { %6085 = vmatmul.mubr.msk.f32.gmra.mrb[4].mxu1 %vm3972_vm7, %v7521_v26  ;;  %6138 = vmatmul.mubr.msk.f32.gmra.mrb[2].mxu0 %vm3972_vm7, %v7648_v62 }
 0x1ac   : > { %6087 = vmatprep.mubr.msk.f32.mxu1 %vm3972_vm7, %v7538_v42  ;;  %6140 = vmatprep.mubr.msk.f32.mxu0 %vm3972_vm7, %v7655_v30 }
 0x1af   : > { %6088 = vmatmul.mubr.msk.f32.gmra.mrb[6].mxu1 %vm3972_vm7, %v7541_v15  ;;  %6141 = vmatmul.mubr.msk.f32.gmra.mrb[4].mxu0 %vm3972_vm7, %v4242_v56 }
 0x1b0   : > { %6092 = vmatprep.mubr.msk.f32.mxu1 %vm3972_vm7, %v4225_v1  ;;  %6143 = vmatprep.mubr.msk.f32.mxu0 %vm3972_vm7, %v4631_v16  ;;  %v5770_v1 = vld [vmem:[%s7770_s25 + $0x30] sm:$0xff] }
 0x1b3   : > { %6093 = vmatmul.mubr.msk.f32.vlgmr.msra.gmra.mrb[0].mxu1 %vm3972_vm7, %v4227_v17  ;;  %6144 = vmatmul.mubr.msk.f32.gmra.mrb[6].mxu0 %vm3972_vm7, %v4633_v3 }
 0x1b4   : > { %6095 = vmatprep.mubr.msk.f32.mxu1 %vm3972_vm7, %v4230_v60  ;;  %6148 = vmatprep.mubr.msk.f32.mxu0 %vm3972_vm7, %v7503_v40  ;;  %v3934_v40 = vld [vmem:[%s7482_s14 + $0x80] sm:$0xff] }
 0x1b5   : > { %6219 = vmatpush3.msk.msra.mxu1 %vm3989_vm6, %v7463_v14  ;;  %v3933_v14 = vld [vmem:[%s7482_s14 + $0x78] sm:$0xff]  ;;  %v4882_v35 = vrot.slane %v3934_v40, 1  ;;  %v5009_v47 = vrot.slane %v3934_v40, 2  ;;  %s5795_s14 = sshll.u32 %s6492_s30, 3 }
 0x1b6   : > { %v4881_v18 = vrot.slane %v3933_v14, 1  ;;  %v5008_v36 = vrot.slane %v3933_v14, 2  ;;  %6188 = vmatprep.subr.msk.mxu1 %vm3989_vm6, %v5158_v32  ;;  %s5509_s13 = sadd.s32 %s5795_s14, %s5791_s26  ;;  %s6418_s14 = sshll.u32 %s6513_s20, 4  ;;  %s6419_s14 = int_to_ptr.vmem [resolvable:$false] %s6418_s14 }
 0x1b7   : > { %6096 = vmatmul.mubr.msk.f32.gmra.mrb[2].mxu1 %vm3972_vm7, %v4232_v63  ;;  %6149 = vmatmul.mubr.msk.f32.vlgmr.msra.gmra.mrb[0].mxu0 %vm3972_vm7, %v7521_v26  ;;  %v4885_v53 = vsel %vm3949_vm8, %v4882_v35, %v4884_v19  ;;  %v5012_v28 = vsel %vm4222_vm9, %v5009_v47, %v5011_v34  ;;  %v5774_v19 = vld [vmem:[%s7770_s25 + $0x50] sm:$0xff]  ;;  %s5792_s30 = sshll.u32 %s5509_s13, 7  ;;  %s6420_s26 = scalar_lea.vmem %s6419_s14, 2048 }
 0x1b8   : > { %6161 = vmatpush3.msk.msra.mxu0 %vm3989_vm6, %v5734_v12  ;;  %6098 = vmatprep.mubr.msk.f32.mxu1 %vm3972_vm7, %v7634_v9  ;;  %v4883_v26 = vsel %vm3949_vm8, %v4881_v18, %v4882_v35  ;;  %v5010_v39 = vsel %vm4222_vm9, %v5008_v36, %v5009_v47  ;;  %v5768_v12 = vld [vmem:[%s7770_s25 + $0x20] sm:$0xff]  ;;  %v5335_v47 = vrot.slane %v5773_v10, 1  ;;  %v5336_v34 = vrot.slane %v5774_v19, 1  ;;  %s7828_s22 = scalar_lea.hbm %s7898_s8, %s5792_s30  ;;  %p6421_p4 = scmp.lt.s32.totalorder %s7830_s9, %s6419_s14 }
 0x1b9   : > { %6151 = vmatprep.mubr.msk.f32.mxu0 %vm3972_vm7, %v7538_v42  ;;  %6174 = vmatprep.subr.msk.mxu0 %vm3989_vm6, %v5744_v46  ;;  %v5326_v29 = vrot.slane %v5768_v12, 1  ;;  %v5772_v35 = vld [vmem:[%s7770_s25 + $0x40] sm:$0x3]  ;;  %p6422_p5 = scmp.lt.s32.totalorder %s6420_s26, %s6414_s16 }
 0x1bb   : > { %6099 = vmatmul.mubr.msk.f32.gmra.mrb[4].mxu1 %vm3972_vm7, %v7648_v62  ;;  %6152 = vmatmul.mubr.msk.f32.gmra.mrb[2].mxu0 %vm3972_vm7, %v7541_v15  ;;  %p6423_p6 = por %p6422_p5, %p6421_p4 }
 0x1bc   : > { %6101 = vmatprep.mubr.msk.f32.mxu1 %vm3972_vm7, %v7655_v30  ;;  %6154 = vmatprep.mubr.msk.f32.mxu0 %vm3972_vm7, %v7563_v49 }
 0x1bd   : > { %p6424_p7 = pnand %p6423_p6, %p6417_p2 }
 0x1bf   : > { %6102 = vmatmul.mubr.msk.f32.gmra.mrb[6].mxu1 %vm3972_vm7, %v4242_v56  ;;  %6155 = vmatmul.mubr.msk.f32.gmra.mrb[4].mxu0 %vm3972_vm7, %v7566_v50 }
 0x1c0   : > { %6112 = vmatprep.mubr.msk.f32.mxu1 %vm3972_vm7, %v7538_v42  ;;  %6157 = vmatprep.mubr.msk.f32.mxu0 %vm3972_vm7, %v3933_v14 }
 0x1c3   : > { %6113 = vmatmul.mubr.msk.f32.vlgmr.msra.gmra.mrb[4].mxu1 %vm3972_vm7, %v7541_v15  ;;  %6158 = vmatmul.mubr.msk.f32.gmra.mrb[6].mxu0 %vm3972_vm7, %v3934_v40  ;;  %v5330_v40 = vrot.slane %v5770_v1, 1 }
 0x1c4   : > { %6115 = vmatprep.mubr.msk.f32.mxu1 %vm3972_vm7, %v7563_v49  ;;  %6162 = vmatprep.mubr.msk.f32.mxu0 %vm3972_vm7, %v7554_v37  ;;  %v5754_v49 = vld [vmem:[%s7894_s4] ss:$0 sm:$0xff] }
 0x1c5   : > { %6189 = vmatpush3.msk.msra.mxu1 %vm3989_vm6, %v5158_v32  ;;  %v5777_v32 = vld [vmem:[%s7770_s25 + $0x68] sm:$0xff] }
 0x1c6   : > { %6202 = vmatprep.subr.msk.mxu1 %vm3989_vm6, %v5345_v22 }
 0x1c7   : > { %6116 = vmatmul.mubr.msk.f32.gmra.mrb[6].mxu1 %vm3972_vm7, %v7566_v50  ;;  %6163 = vmatmul.mubr.msk.f32.vlgmr.msra.gmra.mrb[0].mxu0 %vm3972_vm7, %v7578_v51 }
 0x1c8   : > { %6175 = vmatpush3.msk.msra.mxu0 %vm3989_vm6, %v5744_v46  ;;  %6165 = vmatprep.mubr.msk.f32.mxu0 %vm3972_vm7, %v7584_v41 }
 0x1cb   : > { %6166 = vmatmul.mubr.msk.f32.gmra.mrb[2].mxu0 %vm3972_vm7, %v7597_v55 }
 0x1cc   : > { %6168 = vmatprep.mubr.msk.f32.mxu0 %vm3972_vm7, %v7604_v11 }
 0x1cf   : > { %6169 = vmatmul.mubr.msk.f32.gmra.mrb[4].mxu0 %vm3972_vm7, %v7616_v20 }
 0x1d0   : > { %6171 = vmatprep.mubr.msk.f32.mxu0 %vm3972_vm7, %v4883_v26 }
 0x1d3   : > { %6172 = vmatmul.mubr.msk.f32.gmra.mrb[6].mxu0 %vm3972_vm7, %v4885_v53  ;;  %v5333_v53 = vrot.slane %v5772_v35, 1 }
 0x1d4   : > { %6176 = vmatprep.mubr.msk.f32.mxu0 %vm3972_vm7, %v7634_v9  ;;  %v5767_v9 = vld [vmem:[%s7770_s25 + $0x18] sm:$0xff] }
 0x1d5   : > { %v5325_v23 = vrot.slane %v5767_v9, 1 }
 0x1d7   : > { %6177 = vmatmul.mubr.msk.f32.vlgmr.msra.gmra.mrb[0].mxu0 %vm3972_vm7, %v7648_v62  ;;  %v5327_v14 = vsel %vm3949_vm8, %v5325_v23, %v5326_v29 }
 0x1d8   : > { %6179 = vmatprep.mubr.msk.f32.mxu0 %vm3972_vm7, %v7655_v30 }
 0x1db   : > { %6180 = vmatmul.mubr.msk.f32.gmra.mrb[2].mxu0 %vm3972_vm7, %v4242_v56  ;;  %v5769_v56 = vld [vmem:[%s7770_s25 + $0x28] sm:$0x3] }
 0x1dc   : > { %6182 = vmatprep.mubr.msk.f32.mxu0 %vm3972_vm7, %v4631_v16  ;;  %v5771_v16 = vld [vmem:[%s7770_s25 + $0x38] sm:$0xff] }
 0x1dd   : > { %v5331_v18 = vrot.slane %v5771_v16, 1 }
 0x1df   : > { %6183 = vmatmul.mubr.msk.f32.gmra.mrb[4].mxu0 %vm3972_vm7, %v4633_v3  ;;  %v5328_v3 = vrot.slane %v5769_v56, 1  ;;  %v5332_v36 = vsel %vm3949_vm8, %v5330_v40, %v5331_v18 }
 0x1e0   : > { %6185 = vmatprep.mubr.msk.f32.mxu0 %vm3972_vm7, %v5010_v39  ;;  %v5775_v39 = vld [vmem:[%s7770_s25 + $0x58] sm:$0x3] }
 0x1e1   : > { %v5329_v26 = vsel %vm3949_vm8, %v5326_v29, %v5328_v3 }
 0x1e3   : > { %6186 = vmatmul.mubr.msk.f32.gmra.mrb[6].mxu0 %vm3972_vm7, %v5012_v28  ;;  %v5776_v28 = vld [vmem:[%s7770_s25 + $0x60] sm:$0xff] }
 0x286   : > { %v6094_v42 = vpop.f32.mrb[0].mxu1 }
 0x287   : > { %v4330_v15 = vpop.f32.mrb[1].mxu1 }
 0x28a   : > { %v6097_v43 = vpop.f32.mrb[2].mxu1 }
 0x28b   : > { %v4340_v44 = vpop.f32.mrb[3].mxu1 }
 0x296   : > { %v6114_v31 = vpop.f32.mrb[4].mxu1 }
 0x297   : > { %v4474_v37 = vpop.f32.mrb[5].mxu1 }
 0x29a   : > { %v6117_v45 = vpop.f32.mrb[6].mxu1 }
 0x29b   : > { %v4484_v48 = vpop.f32.mrb[7].mxu1 }
 0x2aa   : > { %v6178_v6 = vpop.f32.mrb[0].mxu0 }
 0x2ab   : > { %v6220_v50 = vadd.f32 %v6178_v6, %v6094_v42  ;;  %v5088_v52 = vpop.f32.mrb[1].mxu0  ;;  %v5338_v42 = vrot.slane %v5775_v39, 1 }
 0x2ac   : > { %v6221_v51 = vadd.f32 %v5088_v52, %v4330_v15  ;;  %v5337_v15 = vsel %vm3949_vm8, %v5335_v47, %v5336_v34 }
 0x2ad   : > { %v5143_v2 = vadd.f32 %v6220_v50, %v5754_v49 }
 0x2ae   : > { %v5142_v41 = vadd.f32 %v6221_v51, %v5754_v49  ;;  %v6181_v13 = vpop.f32.mrb[2].mxu0 }
 0x2af   : > { %v6222_v4 = vadd.f32 %v6181_v13, %v6097_v43  ;;  %v5098_v33 = vpop.f32.mrb[3].mxu0  ;;  %v5151_v61 = vmax.f32 %v5143_v2, 0.0  ;;  %v5340_v43 = vrot.slane %v5776_v28, 1 }
 0x2b0   : > { %v5150_v55 = vmax.f32 %v5142_v41, 0.0  ;;  %v6223_v57 = vadd.f32 %v5098_v33, %v4340_v44  ;;  %v5341_v44 = vrot.slane %v5777_v32, 1 }
 0x2b1   : > { %v5145_v58 = vadd.f32 %v6222_v4, %v5754_v49 }
 0x2b2   : > { %v5144_v11 = vadd.f32 %v6223_v57, %v5754_v49  ;;  %v6184_v38 = vpop.f32.mrb[4].mxu0  ;;  %6190 = vmatprep.mubr.msk.f32.mxu1 %vm3972_vm7, %v5150_v55 }
 0x2b3   : > { %v6224_v20 = vadd.f32 %v6184_v38, %v6114_v31  ;;  %v5108_v60 = vpop.f32.mrb[5].mxu0  ;;  %6191 = vmatmul.mubr.msk.f32.vlgmr.msra.gmra.mrb[8].mxu1 %vm3972_vm7, %v5151_v61  ;;  %v5153_v63 = vmax.f32 %v5145_v58, 0.0  ;;  %v5778_v31 = vld [vmem:[%s7770_s25 + $0x70] sm:$0x3]  ;;  %s7838_s25 = scalar_lea.sflag [#allocation4], %s310_s24 }
 0x2b4   : > { %v5152_v21 = vmax.f32 %v5144_v11, 0.0  ;;  %v6225_v27 = vadd.f32 %v5108_v60, %v4474_v37  ;;  %6203 = vmatpush3.msk.msra.mxu1 %vm3989_vm6, %v5345_v22  ;;  %v5334_v22 = vsel %vm3949_vm8, %v5331_v18, %v5333_v53  ;;  %v5339_v37 = vsel %vm3949_vm8, %v5336_v34, %v5338_v42 }
 0x2b5   : > { %v5147_v0 = vadd.f32 %v6224_v20, %v5754_v49 }
 0x2b6   : > { %v5146_v8 = vadd.f32 %v6225_v27, %v5754_v49  ;;  %v6187_v24 = vpop.f32.mrb[6].mxu0  ;;  %6193 = vmatprep.mubr.msk.f32.mxu1 %vm3972_vm7, %v5152_v21 }
 0x2b7   : > { %v6226_v62 = vadd.f32 %v6187_v24, %v6117_v45  ;;  %v5118_v59 = vpop.f32.mrb[7].mxu0  ;;  %6194 = vmatmul.mubr.msk.f32.gmra.mrb[10].mxu1 %vm3972_vm7, %v5153_v63  ;;  %v5155_v5 = vmax.f32 %v5147_v0, 0.0  ;;  %v5343_v45 = vrot.slane %v5778_v31, 1 }
 0x2b8   : > { %v5154_v54 = vmax.f32 %v5146_v8, 0.0  ;;  %v6227_v30 = vadd.f32 %v5118_v59, %v4484_v48  ;;  %v5342_v48 = vsel %vm3949_vm8, %v5340_v43, %v5341_v44 }
 0x2b9   : > { %v5149_v7 = vadd.f32 %v6226_v62, %v5754_v49  ;;  %v5344_v6 = vsel %vm3949_vm8, %v5341_v44, %v5343_v45 }
 0x2ba   : > { %v5148_v25 = vadd.f32 %v6227_v30, %v5754_v49  ;;  %6196 = vmatprep.mubr.msk.f32.mxu1 %vm3972_vm7, %v5154_v54  ;;  %v5755_v49 = vld [vmem:[%s7896_s6] ss:$0 sm:$0xff] }
 0x2bb   : > { %6197 = vmatmul.mubr.msk.f32.gmra.mrb[12].mxu1 %vm3972_vm7, %v5155_v5  ;;  %v5157_v46 = vmax.f32 %v5149_v7, 0.0 }
 0x2bc   : > { %v5156_v17 = vmax.f32 %v5148_v25, 0.0 }
 0x2be   : > { %6199 = vmatprep.mubr.msk.f32.mxu1 %vm3972_vm7, %v5156_v17 }
 0x2bf   : > { %6200 = vmatmul.mubr.msk.f32.gmra.mrb[14].mxu1 %vm3972_vm7, %v5157_v46 }
 0x2c0   : > { %6204 = vmatprep.mubr.msk.f32.mxu1 %vm3972_vm7, %v5327_v14 }
 0x2c3   : > { %6205 = vmatmul.mubr.msk.f32.vlgmr.msra.gmra.mrb[8].mxu1 %vm3972_vm7, %v5329_v26 }
 0x2c4   : > { %6207 = vmatprep.mubr.msk.f32.mxu1 %vm3972_vm7, %v5332_v36 }
 0x2c7   : > { %6208 = vmatmul.mubr.msk.f32.gmra.mrb[10].mxu1 %vm3972_vm7, %v5334_v22 }
 0x2c8   : > { %6210 = vmatprep.mubr.msk.f32.mxu1 %vm3972_vm7, %v5337_v15 }
 0x2cb   : > { %6211 = vmatmul.mubr.msk.f32.gmra.mrb[12].mxu1 %vm3972_vm7, %v5339_v37 }
 0x2cc   : > { %6213 = vmatprep.mubr.msk.f32.mxu1 %vm3972_vm7, %v5342_v48 }
 0x2cf   : > { %6214 = vmatmul.mubr.msk.f32.gmra.mrb[14].mxu1 %vm3972_vm7, %v5344_v6 }
 0x396   : > { %v6206_v50 = vpop.f32.mrb[8].mxu1 }
 0x397   : > { %v6228_v52 = vadd.f32 %v6206_v50, %v5755_v49  ;;  %v5431_v51 = vpop.f32.mrb[9].mxu1 }
 0x398   : > { %v6229_v2 = vadd.f32 %v5755_v49, %v5431_v51 }
 0x399   : > { %v5479_v41 = vmax.f32 %v6228_v52, 0.0 }
 0x39a   : > { %v5478_v13 = vmax.f32 %v6229_v2, 0.0  ;;  %v6209_v4 = vpop.f32.mrb[10].mxu1 }
 0x39b   : > { %5488 = vst.msk [vmem:[%s6642_s17 + $0x8] sm:$0xff] %vm5486_vm10, %v5479_v41  ;;  %v6230_v33 = vadd.f32 %v6209_v4, %v5755_v49  ;;  %v5441_v55 = vpop.f32.mrb[11].mxu1 }
 0x39c   : > { %5487 = vst.msk [vmem:[%s6642_s17] sm:$0xff] %vm5486_vm10, %v5478_v13  ;;  %v6231_v57 = vadd.f32 %v5755_v49, %v5441_v55 }
 0x39d   : > { %v5481_v61 = vmax.f32 %v6230_v33, 0.0 }
 0x39e   : > { %v5480_v58 = vmax.f32 %v6231_v57, 0.0  ;;  %v6212_v11 = vpop.f32.mrb[12].mxu1 }
 0x39f   : > { %5490 = vst.msk [vmem:[%s6642_s17 + $0x18] sm:$0xff] %vm5486_vm10, %v5481_v61  ;;  %v6232_v38 = vadd.f32 %v6212_v11, %v5755_v49  ;;  %v5451_v20 = vpop.f32.mrb[13].mxu1 }
 0x3a0   : > { %5489 = vst.msk [vmem:[%s6642_s17 + $0x10] sm:$0xff] %vm5486_vm10, %v5480_v58  ;;  %v6233_v60 = vadd.f32 %v5755_v49, %v5451_v20 }
 0x3a1   : > { %v5483_v21 = vmax.f32 %v6232_v38, 0.0 }
 0x3a2   : > { %v5482_v27 = vmax.f32 %v6233_v60, 0.0  ;;  %v6215_v63 = vpop.f32.mrb[14].mxu1 }
 0x3a3   : > { %5492 = vst.msk [vmem:[%s6642_s17 + $0x28] sm:$0xff] %vm5486_vm10, %v5483_v21  ;;  %v6234_v0 = vadd.f32 %v6215_v63, %v5755_v49  ;;  %v5461_v8 = vpop.f32.mrb[15].mxu1 }
 0x3a4   : > { %5491 = vst.msk [vmem:[%s6642_s17 + $0x20] sm:$0xff] %vm5486_vm10, %v5482_v27  ;;  %v6235_v24 = vadd.f32 %v5755_v49, %v5461_v8 }
 0x3a5   : > { %v5485_v9 = vmax.f32 %v6234_v0, 0.0 }
 0x3a6   : > { %v5484_v12 = vmax.f32 %v6235_v24, 0.0 }
 0x3a7   : > { %5494 = vst.msk [vmem:[%s6642_s17 + $0x38] sm:$0xff] %vm5486_vm10, %v5485_v9 }
 0x3a8   : > { %5493 = vst.msk [vmem:[%s6642_s17 + $0x30] sm:$0xff] %vm5486_vm10, %v5484_v12 }
 0x3a9   : > { %6427 = shalt.err (!%p6424_p7)
}
 0x3aa   : > { %s6428_s24 = scalar_lea.hbm %s7828_s22, 1024  ;;  %s6432_s30 = scalar_lea.hbm %s7898_s8, 8192 }
 0x3ab   : > { %p6429_p9 = scmp.ne.s32.totalorder %s7828_s22, %s6428_s24  ;;  %p6433_p12 = scmp.lt.u32.totalorder %s7828_s22, %s7898_s8 }
 0x3ac   : > { %p6434_p13 = scmp.lt.u32.totalorder %s6432_s30, %s6428_s24  ;;  %p6436_p1 = scmp.lt.u32.totalorder %s6428_s24, %s7828_s22 }
 0x3ad   : > { %p6430_p10 = pnand %p6429_p9, %p6612_p3 }
 0x3ae   : > { %p6435_p0 = por %p6434_p13, %p6433_p12 }
 0x3af   : > { %p6431_p11 = pneg %p6430_p10 }
 0x3b0   : > { %p6437_p2 = por %p6436_p1, %p6435_p0 }
 0x3b2   : > { %p6438_p4 = pnand %p6437_p2, %p6431_p11 }
 0x3b4   : > { %6441 = shalt.err (!%p6438_p4)
}
 0x3b5   : > { %s6514_s16 = smov 128   ;;  %s6515_s20 = smov 8  }
 0x3b6   : > { %6301 = dma.vmem_to_hbm [thread:$0]  (%p6612_p3), %s7830_s9, 1024, %s7828_s22, %s7838_s25, %s6514_s16, %s6514_s16, %s6515_s20  }
 0x3b7 PF: > { %p6307_p5 = scmp.ge.s32.totalorder %s6508_s12, 2  ;;  %s5527_s14 = sand.u32 1, %s6480_s27  }
 0x3b8   : > { %s5528_s26 = scalar_lea.sflag [#allocation4], %s5527_s14 }
 0x3b9   : > { %p6304_p6 = pnand %p6307_p5, %p6621_p8 }
 0x3bb   : > { %6475 = dma.done.wait (!%p6304_p6), %s5528_s26, 1024  }
 0x3bc   : > { %6477 = vsyncadd (!%p6304_p6), %s5528_s26, 4294966272  ;;  %s21_s12 = sadd.s32 1, %s6508_s12   ;;  %s7905_s18 = sld [smem:[#allocation6_spill]] }
 0x3bd   : > { %p18_p7 = scmp.ge.s32.totalorder %s21_s12, 10   ;;  %s7906_s22 = sld [smem:[#allocation7_spill]] }
 0x3be   : > { %s7907_s27 = smov %s6484_s28  ;;  %s7908_s28 = smov %s6488_s29 }
 0x3bf   : > { %s7909_s29 = smov %s6630_s23  ;;  %s7910_s30 = smov %s6500_s10 }
 0x3c0   : > { %s7911_s9 = smov %s6504_s11  ;;  %20 = sbr.rel (!%p18_p7) target bundleno = 5 (0x5), region = 101 }
 0x3c2   : > { %s7912_s10 = smov %s7905_s18 }
 0x3c3   : > { %s7913_s11 = smov %s7906_s22 }
 0x3c7   :  { %5533 = vsyncpa [#allocation4], 1 }
 0x3c8   :  { %5535 = vsyncpa [#allocation4 + $0x1], 1 }

</bundles_post_ra>
